<compile_context>
chip_gen: v6e
topology: v6e:2x2x1
jax: 0.10.0
libtpu: 0.0.40
codegen_flags: <defaults>
</compile_context>

<pallas_src>
import functools

import jax
import jax.numpy as jnp
from jax.experimental import pallas as pl
from jax.experimental.pallas import tpu as pltpu

LANE = 128


def _round_up(n, m):
    return ((n + m - 1) // m) * m


def _pick_batch_block(N, L, Cp, Pp, C4p, K,
                      vmem_budget=24 * 1024 * 1024,
                      target_rows=256, min_steps=2):
    """Samples per grid step: feed the MXU >= target_rows rows when possible,
    keep >= min_steps grid steps (pipelining + both v7x TensorCores), and keep
    the per-step working set inside a conservative VMEM budget."""
    def block_bytes(b):
        rows = b * L
        io = 2 * 2 * rows * (Cp + C4p)                 # bf16 x/out, double-buffered
        inter = rows * (4 * (4 + K) * Pp + 20 * C4p)   # rough f32/bf16 temporaries
        return io + inter

    divs = [d for d in range(1, N + 1) if N % d == 0]
    fits = [d for d in divs if block_bytes(d) <= vmem_budget] or [1]
    pref = [d for d in fits if N // d >= min_steps] or fits
    for d in pref:
        if d * L >= target_rows:
            return d
    return pref[-1]


# ---------------------------------------------------------------------------
# Pallas kernel: one SE-ResNet bottleneck block for a block of B samples
# ---------------------------------------------------------------------------
def bottleneck_kernel(
    x_ref,      # (B, Lp, Cp)      bf16 input (channels zero-padded)
    w1_ref,     # (Cp, Pp)         bf16 conv1 weight (BN1 scale folded in)
    b1_ref,     # (1, Pp)          f32 folded BN1 bias
    w2_ref,     # (K*Pp, Pp)       bf16 conv2 weight, taps stacked on rows
    b2_ref,     # (1, Pp)          f32 folded BN2 bias
    w3_ref,     # (Pp, C4p)        bf16 conv3 weight (BN3 scale folded in)
    b3_ref,     # (1, C4p)         f32 folded BN3 bias
    wse1_ref,   # (Hp, C4p)        f32 SE fc1 weight (out, in)
    wse2_ref,   # (Hp, C4p)        f32 SE fc2 weight, transposed to (in, out)
    o_ref,      # (B, Lp, C4p)     bf16 output
    *,
    kernel_size,
    valid_len,
):
    B, Lp, Cp = x_ref.shape
    K = kernel_size
    pad = (K - 1) // 2
    Pp = w1_ref.shape[1]
    C4p = w3_ref.shape[1]
    rows = B * Lp

    x = x_ref[...]                                           # (B, Lp, Cp) bf16

    # ---- conv1 (1x1, BN1 scale folded) + bias + SiLU ------------------------
    h1 = jnp.dot(x.reshape(rows, Cp), w1_ref[...],
                 preferred_element_type=jnp.float32)
    h1 = jax.nn.silu(h1 + b1_ref[...])                       # (rows, Pp) f32

    # ---- conv2 (k x 1, 'same'): K taps fused into one bf16 matmul -----------
    h1b = h1.astype(jnp.bfloat16).reshape(B, Lp, Pp)
    if valid_len != Lp:
        # zero the L-padding rows so 'same' conv boundary semantics hold
        row = jax.lax.broadcasted_iota(jnp.int32, (B, Lp, 1), 1)
        h1b = jnp.where(row < valid_len, h1b, jnp.zeros_like(h1b))
    if pad > 0:
        zer = jnp.zeros((B, pad, Pp), jnp.bfloat16)
        h1p = jnp.concatenate([zer, h1b, zer], axis=1)       # (B, Lp+2*pad, Pp)
    else:
        h1p = h1b
    if K == 1:
        taps = h1p
    else:
        taps = jnp.concatenate([h1p[:, t:t + Lp, :] for t in range(K)],
                               axis=-1)                      # (B, Lp, K*Pp)
    h2 = jnp.dot(taps.reshape(rows, K * Pp), w2_ref[...],
                 preferred_element_type=jnp.float32)
    h2 = jax.nn.silu(h2 + b2_ref[...])                       # (rows, Pp) f32
    # dropout(p=0.2): eval-mode identity
    # TODO(synk): training-mode dropout (pltpu.prng_* random mask) not implemented.

    # ---- conv3 (1x1, BN3 scale folded) + bias --------------------------------
    h3 = jnp.dot(h2.astype(jnp.bfloat16), w3_ref[...],
                 preferred_element_type=jnp.float32)
    h3 = (h3 + b3_ref[...]).reshape(B, Lp, C4p)              # (B, Lp, C4p) f32

    # ---- Squeeze-and-Excitation (tiny -> VPU/XLU, not the MXU) ---------------
    if valid_len != Lp:
        row = jax.lax.broadcasted_iota(jnp.int32, (B, Lp, 1), 1)
        h3m = jnp.where(row < valid_len, h3, jnp.zeros_like(h3))
        pooled = jnp.sum(h3m, axis=1, keepdims=True) * (1.0 / valid_len)
    else:
        pooled = jnp.mean(h3, axis=1, keepdims=True)         # (B, 1, C4p)
    z = jax.nn.silu(jnp.sum(wse1_ref[...][None, :, :] * pooled, axis=-1))  # (B, Hp)
    gate = jax.nn.sigmoid(
        jnp.sum(wse2_ref[...][None, :, :] * z[:, :, None], axis=1))        # (B, C4p)
    gate = gate[:, None, :]

    # ---- residual add (downsample=None -> identity = x) + final SiLU ---------
    out = jax.nn.silu(h3 * gate + x.astype(jnp.float32))
    o_ref[...] = out.astype(o_ref.dtype)


# ---------------------------------------------------------------------------
# Wrapper: fold BN scale into weights, pad to lane/sublane multiples, pick block
# ---------------------------------------------------------------------------
def bottleneck_forward(x, params, kernel_size):
    """x: (N, L, Cin) float32, channels-last NLC. Returns (N, L, C4) bfloat16."""
    N, L, Cin = x.shape
    P = params["w1"].shape[1]
    C4 = params["w3"].shape[1]
    H = params["wse1"].shape[0]
    K = kernel_size
    assert K % 2 == 1, "PyTorch 'same' conv in this block requires odd kernel_size"
    assert Cin == C4, "downsample=None requires inplanes == planes * expansion"

    Cp = _round_up(Cin, LANE)
    Pp = _round_up(P, LANE)
    C4p = _round_up(C4, LANE)
    Hp = _round_up(H, 8)          # SE hidden on the sublane axis only
    Lp = _round_up(L, 16)         # bf16 sublane packing for clean reshapes

    bf16, f32 = jnp.bfloat16, jnp.float32

    # ---- fold BN scale into conv weights (f32), then pad + cast to bf16 ------
    w1 = params["w1"] * params["s1"][None, :]                 # (Cin, P)
    w2 = params["w2"] * params["s2"][None, None, :]           # (K, P, P)
    w3 = params["w3"] * params["s3"][None, :]                 # (P, C4)

    def pad2(a, r, c, dt):
        if a.shape != (r, c):
            a = jnp.pad(a, ((0, r - a.shape[0]), (0, c - a.shape[1])))
        return a.astype(dt)

    w1p = pad2(w1, Cp, Pp, bf16)                              # (Cp, Pp)
    if Pp != P:
        w2 = jnp.pad(w2, ((0, 0), (0, Pp - P), (0, Pp - P)))
    w2p = w2.astype(bf16).reshape(K * Pp, Pp)                 # taps stacked on rows
    w3p = pad2(w3, Pp, C4p, bf16)                             # (Pp, C4p)

    def padrow(v, n):
        if v.shape[0] != n:
            v = jnp.pad(v, (0, n - v.shape[0]))
        return v.astype(f32)[None, :]

    b1p = padrow(params["b1"], Pp)
    b2p = padrow(params["b2"], Pp)
    b3p = padrow(params["b3"], C4p)

    wse1p = pad2(params["wse1"], Hp, C4p, f32)                # (Hp, C4p) (out,in)
    wse2p = pad2(params["wse2"].T, Hp, C4p, f32)              # (Hp, C4p) (in,out)

    # ---- activations: bf16, pad only when needed -----------------------------
    xp = x
    if Cp != Cin or Lp != L:
        xp = jnp.pad(x, ((0, 0), (0, Lp - L), (0, Cp - Cin)))
    xp = xp.astype(bf16)

    B = _pick_batch_block(N, Lp, Cp, Pp, C4p, K)
    grid = (N // B,)

    kernel = functools.partial(bottleneck_kernel, kernel_size=K, valid_len=L)
    full = lambda shape: pl.BlockSpec(shape, lambda i: (0,) * len(shape))

    # NOTE: weight specs use default double buffering; on v7x with very wide
    # channels they could be single-buffered to reclaim VMEM for a bigger block.
    out = pl.pallas_call(
        kernel,
        out_shape=jax.ShapeDtypeStruct((N, Lp, C4p), bf16),
        grid_spec=pltpu.PrefetchScalarGridSpec(
            num_scalar_prefetch=0,
            grid=grid,
            in_specs=[
                pl.BlockSpec((B, Lp, Cp), lambda i: (i, 0, 0)),
                full((Cp, Pp)), full((1, Pp)),
                full((K * Pp, Pp)), full((1, Pp)),
                full((Pp, C4p)), full((1, C4p)),
                full((Hp, C4p)), full((Hp, C4p)),
            ],
            out_specs=pl.BlockSpec((B, Lp, C4p), lambda i: (i, 0, 0)),
        ),
        compiler_params=pltpu.CompilerParams(
            dimension_semantics=("parallel",),
            vmem_limit_bytes=48 * 1024 * 1024,
        ),
    )(xp, w1p, b1p, w2p, b2p, w3p, b3p, wse1p, wse2p)

    if Lp != L or C4p != C4:
        out = out[:, :L, :C4]
    return out


# ---------------------------------------------------------------------------
# Parameter construction (deterministic, synthetic; PyTorch-equivalent layouts)
# ---------------------------------------------------------------------------
def make_params(key, inplanes, planes, kernel_size, reduction=16):
    expansion = 4
    c4 = planes * expansion
    hid = c4 // reduction
    ks = jax.random.split(key, 16)
    r = lambda k, shape: 0.1 * jax.random.normal(k, shape, jnp.float32)

    # conv weights in PyTorch layout, then moved to channels-last math layout
    w1 = r(ks[0], (planes, inplanes))             # conv1x1 (out, in)
    w2 = r(ks[1], (planes, planes, kernel_size))  # convkx1 (out, in, k)
    w3 = r(ks[2], (c4, planes))                   # conv1x1 (out, in)

    def bn(kg, kb, km, kv, c, eps=1e-5):
        gamma = 1.0 + 0.1 * jax.random.normal(kg, (c,), jnp.float32)
        beta = 0.1 * jax.random.normal(kb, (c,), jnp.float32)
        mean = 0.1 * jax.random.normal(km, (c,), jnp.float32)
        var = jax.random.uniform(kv, (c,), jnp.float32, 0.5, 1.5)
        scale = gamma / jnp.sqrt(var + eps)
        bias = beta - mean * scale
        return scale, bias

    s1, b1 = bn(ks[3], ks[4], ks[5], ks[6], planes)
    s2, b2 = bn(ks[7], ks[8], ks[9], ks[10], planes)
    s3, b3 = bn(ks[11], ks[12], ks[13], ks[14], c4)

    wse1 = r(ks[15], (hid, c4))                        # nn.Linear(c4, hid)
    wse2 = r(jax.random.fold_in(key, 99), (c4, hid))   # nn.Linear(hid, c4)

    return {
        "w1": w1.T,                           # (Cin, P)
        "w2": jnp.transpose(w2, (2, 1, 0)),   # (K, in, out)
        "w3": w3.T,                           # (P, C4)
        "s1": s1, "b1": b1, "s2": s2, "b2": b2, "s3": s3, "b3": b3,
        "wse1": wse1,                         # (H, C4)
        "wse2": wse2,                         # (C4, H)
    }


# ---------------------------------------------------------------------------
# Pure-JAX reference with the same precision policy (folded bf16 weights,
# bf16 operands, f32 accumulation)
# ---------------------------------------------------------------------------
def reference(x, p, kernel_size):
    bf16, f32 = jnp.bfloat16, jnp.float32
    pad = (kernel_size - 1) // 2
    L = x.shape[1]

    w1 = (p["w1"] * p["s1"][None, :]).astype(bf16)
    w2 = (p["w2"] * p["s2"][None, None, :]).astype(bf16)
    w3 = (p["w3"] * p["s3"][None, :]).astype(bf16)
    xb = x.astype(bf16)

    h1 = jnp.einsum("nlc,cp->nlp", xb, w1, preferred_element_type=f32)
    h1 = jax.nn.silu(h1 + p["b1"])

    h1p = jnp.pad(h1.astype(bf16), ((0, 0), (pad, pad), (0, 0)))
    acc = sum(
        jnp.einsum("nlc,co->nlo", h1p[:, t:t + L, :], w2[t],
                   preferred_element_type=f32)
        for t in range(kernel_size))
    h2 = jax.nn.silu(acc + p["b2"])

    h3 = jnp.einsum("nlc,co->nlo", h2.astype(bf16), w3,
                    preferred_element_type=f32) + p["b3"]

    pooled = jnp.mean(h3, axis=1)                               # (N, C4)
    z = jax.nn.silu(pooled @ p["wse1"].T)                       # (N, H)
    gate = jax.nn.sigmoid(z @ p["wse2"].T)                      # (N, C4)
    h3 = h3 * gate[:, None, :]
    return jax.nn.silu(h3 + xb.astype(f32))


# ---------------------------------------------------------------------------
if __name__ == "__main__":
    # Small shapes consistent with the module: downsample=None requires
    # inplanes == planes * expansion.  N=8, L=64 gives the kernel 2 grid steps
    # of B=4 samples -> 256 matmul rows per step.
    N, L = 8, 64
    planes, kernel_size = 16, 3
    inplanes = planes * 4          # 64 channels in / out

    key = jax.random.PRNGKey(0)
    kx, kp = jax.random.split(key)
    x = jax.random.normal(kx, (N, L, inplanes), jnp.float32)   # layout NLC
    params = make_params(kp, inplanes, planes, kernel_size)

    out = bottleneck_forward(x, params, kernel_size)
    out = jax.block_until_ready(out)
    out_f32 = out.astype(jnp.float32)

    ref = reference(x, params, kernel_size)
    assert out.shape == (N, L, inplanes)
    max_err = float(jnp.max(jnp.abs(out_f32 - ref)))
    # bf16 output rounding + accumulation-order differences only.
    assert jnp.allclose(out_f32, ref, rtol=2e-2, atol=2e-2), max_err

    print("KERNEL_OK")
</pallas_src>

<mosaic_0001>
module attributes {stable_mosaic.version = 11 : i64} {
  func.func @bottleneck_kernel(%arg0: i32, %arg1: memref<4x64x128xbf16, #tpu.memory_space<vmem>>, %arg2: memref<128x128xbf16, #tpu.memory_space<vmem>>, %arg3: memref<1x128xf32, #tpu.memory_space<vmem>>, %arg4: memref<384x128xbf16, #tpu.memory_space<vmem>>, %arg5: memref<1x128xf32, #tpu.memory_space<vmem>>, %arg6: memref<128x128xbf16, #tpu.memory_space<vmem>>, %arg7: memref<1x128xf32, #tpu.memory_space<vmem>>, %arg8: memref<8x128xf32, #tpu.memory_space<vmem>>, %arg9: memref<8x128xf32, #tpu.memory_space<vmem>>, %arg10: memref<4x64x128xbf16, #tpu.memory_space<vmem>>) attributes {dimension_semantics = [#tpu.dimension_semantics<parallel>], iteration_bounds = array<i64: 2>, scalar_prefetch = 0 : i64, scratch_operands = 0 : i64, tpu.core_type = #tpu.core_type<tc>, window_params = [{transform_indices = @transform_0, window_bounds = array<i64: 4, 64, 128>}, {pipeline_mode = #tpu.pipeline_mode<synchronous>, transform_indices = @transform_1, window_bounds = array<i64: 128, 128>}, {pipeline_mode = #tpu.pipeline_mode<synchronous>, transform_indices = @transform_2, window_bounds = array<i64: 1, 128>}, {pipeline_mode = #tpu.pipeline_mode<synchronous>, transform_indices = @transform_3, window_bounds = array<i64: 384, 128>}, {pipeline_mode = #tpu.pipeline_mode<synchronous>, transform_indices = @transform_4, window_bounds = array<i64: 1, 128>}, {pipeline_mode = #tpu.pipeline_mode<synchronous>, transform_indices = @transform_5, window_bounds = array<i64: 128, 128>}, {pipeline_mode = #tpu.pipeline_mode<synchronous>, transform_indices = @transform_6, window_bounds = array<i64: 1, 128>}, {pipeline_mode = #tpu.pipeline_mode<synchronous>, transform_indices = @transform_7, window_bounds = array<i64: 8, 128>}, {pipeline_mode = #tpu.pipeline_mode<synchronous>, transform_indices = @transform_8, window_bounds = array<i64: 8, 128>}, {transform_indices = @transform_9, window_bounds = array<i64: 4, 64, 128>}]} {
    %c0 = arith.constant 0 : index
    %c0_0 = arith.constant 0 : index
    %c0_1 = arith.constant 0 : index
    %0 = vector.load %arg1[%c0, %c0_0, %c0_1] : memref<4x64x128xbf16, #tpu.memory_space<vmem>>, vector<4x64x128xbf16>
    %1 = vector.shape_cast %0 : vector<4x64x128xbf16> to vector<256x128xbf16>
    %c0_2 = arith.constant 0 : index
    %c0_3 = arith.constant 0 : index
    %2 = vector.load %arg2[%c0_2, %c0_3] : memref<128x128xbf16, #tpu.memory_space<vmem>>, vector<128x128xbf16>
    %cst = arith.constant dense<0.000000e+00> : vector<256x128xf32>
    %3 = tpu.matmul %1, %2, %cst {dimension_numbers = #tpu.dot_dimension_numbers<[1], [0], [0], [1], [0, 0, 1, 1], [], []>} : vector<256x128xbf16>, vector<128x128xbf16>, vector<256x128xf32> -> vector<256x128xf32>
    %c0_4 = arith.constant 0 : index
    %c0_5 = arith.constant 0 : index
    %4 = vector.load %arg3[%c0_4, %c0_5] : memref<1x128xf32, #tpu.memory_space<vmem>>, vector<1x128xf32>
    %5 = vector.broadcast %4 : vector<1x128xf32> to vector<256x128xf32>
    %6 = arith.addf %3, %5 : vector<256x128xf32>
    %7 = arith.negf %6 : vector<256x128xf32>
    %8 = math.exp %7 : vector<256x128xf32>
    %cst_6 = arith.constant 1.000000e+00 : f32
    %9 = vector.broadcast %cst_6 : f32 to vector<256x128xf32>
    %10 = arith.addf %9, %8 : vector<256x128xf32>
    %11 = arith.divf %9, %10 : vector<256x128xf32>
    %12 = arith.mulf %6, %11 : vector<256x128xf32>
    %13 = arith.truncf %12 : vector<256x128xf32> to vector<256x128xbf16>
    %14 = vector.shape_cast %13 : vector<256x128xbf16> to vector<4x64x128xbf16>
    %cst_7 = arith.constant 0.000000e+00 : bf16
    %15 = vector.broadcast %cst_7 : bf16 to vector<4x1x128xbf16>
    %16 = tpu.concatenate %15, %14, %15 in 1 : vector<4x1x128xbf16>, vector<4x64x128xbf16>, vector<4x1x128xbf16> -> vector<4x66x128xbf16>
    %17 = vector.extract_strided_slice %16 {offsets = [0, 0, 0], sizes = [4, 64, 128], strides = [1, 1, 1]} : vector<4x66x128xbf16> to vector<4x64x128xbf16>
    %18 = vector.extract_strided_slice %16 {offsets = [0, 1, 0], sizes = [4, 64, 128], strides = [1, 1, 1]} : vector<4x66x128xbf16> to vector<4x64x128xbf16>
    %19 = vector.extract_strided_slice %16 {offsets = [0, 2, 0], sizes = [4, 64, 128], strides = [1, 1, 1]} : vector<4x66x128xbf16> to vector<4x64x128xbf16>
    %20 = tpu.concatenate %17, %18, %19 in 2 : vector<4x64x128xbf16>, vector<4x64x128xbf16>, vector<4x64x128xbf16> -> vector<4x64x384xbf16>
    %21 = vector.shape_cast %20 : vector<4x64x384xbf16> to vector<256x384xbf16>
    %c0_8 = arith.constant 0 : index
    %c0_9 = arith.constant 0 : index
    %22 = vector.load %arg4[%c0_8, %c0_9] : memref<384x128xbf16, #tpu.memory_space<vmem>>, vector<384x128xbf16>
    %cst_10 = arith.constant dense<0.000000e+00> : vector<256x128xf32>
    %23 = tpu.matmul %21, %22, %cst_10 {dimension_numbers = #tpu.dot_dimension_numbers<[1], [0], [0], [1], [0, 0, 1, 1], [], []>} : vector<256x384xbf16>, vector<384x128xbf16>, vector<256x128xf32> -> vector<256x128xf32>
    %c0_11 = arith.constant 0 : index
    %c0_12 = arith.constant 0 : index
    %24 = vector.load %arg5[%c0_11, %c0_12] : memref<1x128xf32, #tpu.memory_space<vmem>>, vector<1x128xf32>
    %25 = vector.broadcast %24 : vector<1x128xf32> to vector<256x128xf32>
    %26 = arith.addf %23, %25 : vector<256x128xf32>
    %27 = arith.negf %26 : vector<256x128xf32>
    %28 = math.exp %27 : vector<256x128xf32>
    %cst_13 = arith.constant 1.000000e+00 : f32
    %29 = vector.broadcast %cst_13 : f32 to vector<256x128xf32>
    %30 = arith.addf %29, %28 : vector<256x128xf32>
    %31 = arith.divf %29, %30 : vector<256x128xf32>
    %32 = arith.mulf %26, %31 : vector<256x128xf32>
    %33 = arith.truncf %32 : vector<256x128xf32> to vector<256x128xbf16>
    %c0_14 = arith.constant 0 : index
    %c0_15 = arith.constant 0 : index
    %34 = vector.load %arg6[%c0_14, %c0_15] : memref<128x128xbf16, #tpu.memory_space<vmem>>, vector<128x128xbf16>
    %cst_16 = arith.constant dense<0.000000e+00> : vector<256x128xf32>
    %35 = tpu.matmul %33, %34, %cst_16 {dimension_numbers = #tpu.dot_dimension_numbers<[1], [0], [0], [1], [0, 0, 1, 1], [], []>} : vector<256x128xbf16>, vector<128x128xbf16>, vector<256x128xf32> -> vector<256x128xf32>
    %c0_17 = arith.constant 0 : index
    %c0_18 = arith.constant 0 : index
    %36 = vector.load %arg7[%c0_17, %c0_18] : memref<1x128xf32, #tpu.memory_space<vmem>>, vector<1x128xf32>
    %37 = vector.broadcast %36 : vector<1x128xf32> to vector<256x128xf32>
    %38 = arith.addf %35, %37 : vector<256x128xf32>
    %39 = vector.shape_cast %38 : vector<256x128xf32> to vector<4x64x128xf32>
    %cst_19 = arith.constant dense<0.000000e+00> : vector<4x128xf32>
    %40 = vector.multi_reduction <add>, %39, %cst_19 [1] : vector<4x64x128xf32> to vector<4x128xf32>
    %41 = vector.shape_cast %40 : vector<4x128xf32> to vector<4x1x128xf32>
    %cst_20 = arith.constant 6.400000e+01 : f32
    %42 = vector.broadcast %cst_20 : f32 to vector<4x1x128xf32>
    %43 = arith.divf %41, %42 : vector<4x1x128xf32>
    %c0_21 = arith.constant 0 : index
    %c0_22 = arith.constant 0 : index
    %44 = vector.load %arg8[%c0_21, %c0_22] : memref<8x128xf32, #tpu.memory_space<vmem>>, vector<8x128xf32>
    %45 = vector.shape_cast %44 : vector<8x128xf32> to vector<1x8x128xf32>
    %46 = vector.broadcast %45 : vector<1x8x128xf32> to vector<4x8x128xf32>
    %47 = vector.broadcast %43 : vector<4x1x128xf32> to vector<4x8x128xf32>
    %48 = arith.mulf %46, %47 : vector<4x8x128xf32>
    %cst_23 = arith.constant dense<0.000000e+00> : vector<4x8xf32>
    %49 = vector.multi_reduction <add>, %48, %cst_23 [2] : vector<4x8x128xf32> to vector<4x8xf32>
    %50 = arith.negf %49 : vector<4x8xf32>
    %51 = math.exp %50 : vector<4x8xf32>
    %cst_24 = arith.constant 1.000000e+00 : f32
    %52 = vector.broadcast %cst_24 : f32 to vector<4x8xf32>
    %53 = arith.addf %52, %51 : vector<4x8xf32>
    %54 = arith.divf %52, %53 : vector<4x8xf32>
    %55 = arith.mulf %49, %54 : vector<4x8xf32>
    %c0_25 = arith.constant 0 : index
    %c0_26 = arith.constant 0 : index
    %56 = vector.load %arg9[%c0_25, %c0_26] : memref<8x128xf32, #tpu.memory_space<vmem>>, vector<8x128xf32>
    %57 = vector.shape_cast %56 : vector<8x128xf32> to vector<1x8x128xf32>
    %58 = vector.shape_cast %55 : vector<4x8xf32> to vector<4x8x1xf32>
    %59 = vector.broadcast %57 : vector<1x8x128xf32> to vector<4x8x128xf32>
    %60 = vector.broadcast %58 : vector<4x8x1xf32> to vector<4x8x128xf32>
    %61 = arith.mulf %59, %60 : vector<4x8x128xf32>
    %cst_27 = arith.constant dense<0.000000e+00> : vector<4x128xf32>
    %62 = vector.multi_reduction <add>, %61, %cst_27 [1] : vector<4x8x128xf32> to vector<4x128xf32>
    %63 = arith.negf %62 : vector<4x128xf32>
    %64 = math.exp %63 : vector<4x128xf32>
    %cst_28 = arith.constant 1.000000e+00 : f32
    %65 = vector.broadcast %cst_28 : f32 to vector<4x128xf32>
    %66 = arith.addf %65, %64 : vector<4x128xf32>
    %67 = arith.divf %65, %66 : vector<4x128xf32>
    %68 = vector.shape_cast %67 : vector<4x128xf32> to vector<4x1x128xf32>
    %69 = vector.broadcast %68 : vector<4x1x128xf32> to vector<4x64x128xf32>
    %70 = arith.mulf %39, %69 : vector<4x64x128xf32>
    %71 = arith.extf %0 : vector<4x64x128xbf16> to vector<4x64x128xf32>
    %72 = arith.addf %70, %71 : vector<4x64x128xf32>
    %73 = arith.negf %72 : vector<4x64x128xf32>
    %74 = math.exp %73 : vector<4x64x128xf32>
    %cst_29 = arith.constant 1.000000e+00 : f32
    %75 = vector.broadcast %cst_29 : f32 to vector<4x64x128xf32>
    %76 = arith.addf %75, %74 : vector<4x64x128xf32>
    %77 = arith.divf %75, %76 : vector<4x64x128xf32>
    %78 = arith.mulf %72, %77 : vector<4x64x128xf32>
    %79 = arith.truncf %78 : vector<4x64x128xf32> to vector<4x64x128xbf16>
    %c0_30 = arith.constant 0 : index
    %c0_31 = arith.constant 0 : index
    %c0_32 = arith.constant 0 : index
    %80 = vector.load %arg10[%c0_30, %c0_31, %c0_32] : memref<4x64x128xbf16, #tpu.memory_space<vmem>>, vector<4x64x128xbf16>
    tpu.vector_store %arg10[%c0_30, %c0_31, %c0_32], %79 {strides = array<i32>} : memref<4x64x128xbf16, #tpu.memory_space<vmem>>, vector<4x64x128xbf16>,
    return
  }
  func.func @transform_0(%arg0: i32) -> (i32, i32, i32) {
    %c0_i32 = arith.constant 0 : i32
    %c0_i32_0 = arith.constant 0 : i32
    %c0_i32_1 = arith.constant 0 : i32
    return %arg0, %c0_i32, %c0_i32_0 : i32, i32, i32
  }
  func.func @transform_1(%arg0: i32) -> (i32, i32) {
    %c0_i32 = arith.constant 0 : i32
    %c0_i32_0 = arith.constant 0 : i32
    %c0_i32_1 = arith.constant 0 : i32
    return %c0_i32, %c0_i32_0 : i32, i32
  }
  func.func @transform_2(%arg0: i32) -> (i32, i32) {
    %c0_i32 = arith.constant 0 : i32
    %c0_i32_0 = arith.constant 0 : i32
    %c0_i32_1 = arith.constant 0 : i32
    return %c0_i32, %c0_i32_0 : i32, i32
  }
  func.func @transform_3(%arg0: i32) -> (i32, i32) {
    %c0_i32 = arith.constant 0 : i32
    %c0_i32_0 = arith.constant 0 : i32
    %c0_i32_1 = arith.constant 0 : i32
    return %c0_i32, %c0_i32_0 : i32, i32
  }
  func.func @transform_4(%arg0: i32) -> (i32, i32) {
    %c0_i32 = arith.constant 0 : i32
    %c0_i32_0 = arith.constant 0 : i32
    %c0_i32_1 = arith.constant 0 : i32
    return %c0_i32, %c0_i32_0 : i32, i32
  }
  func.func @transform_5(%arg0: i32) -> (i32, i32) {
    %c0_i32 = arith.constant 0 : i32
    %c0_i32_0 = arith.constant 0 : i32
    %c0_i32_1 = arith.constant 0 : i32
    return %c0_i32, %c0_i32_0 : i32, i32
  }
  func.func @transform_6(%arg0: i32) -> (i32, i32) {
    %c0_i32 = arith.constant 0 : i32
    %c0_i32_0 = arith.constant 0 : i32
    %c0_i32_1 = arith.constant 0 : i32
    return %c0_i32, %c0_i32_0 : i32, i32
  }
  func.func @transform_7(%arg0: i32) -> (i32, i32) {
    %c0_i32 = arith.constant 0 : i32
    %c0_i32_0 = arith.constant 0 : i32
    %c0_i32_1 = arith.constant 0 : i32
    return %c0_i32, %c0_i32_0 : i32, i32
  }
  func.func @transform_8(%arg0: i32) -> (i32, i32) {
    %c0_i32 = arith.constant 0 : i32
    %c0_i32_0 = arith.constant 0 : i32
    %c0_i32_1 = arith.constant 0 : i32
    return %c0_i32, %c0_i32_0 : i32, i32
  }
  func.func @transform_9(%arg0: i32) -> (i32, i32, i32) {
    %c0_i32 = arith.constant 0 : i32
    %c0_i32_0 = arith.constant 0 : i32
    %c0_i32_1 = arith.constant 0 : i32
    return %arg0, %c0_i32, %c0_i32_0 : i32, i32, i32
  }
}

</mosaic_0001>

<bundles_post_ra>
// kernel: tpu_custom_call.1
= control target key start
LH: loop header
LB: loop body
LE: loop exit
PB: predicated region body
PF: predicated region fallthrough
CT: control target
= control target key end

     0   :  { %s5831_s0 = inlined_call_operand.hbm [shape: bf16[8,64,128], index: 0, kind: input, shape index: {}]   ;;  %s5832_s1 = inlined_call_operand.hbm [shape: bf16[128,128], index: 1, kind: input, shape index: {}]   ;;  %s5833_s2 = inlined_call_operand.vmem [shape: f32[1,128], index: 2, kind: input, shape index: {}]   ;;  %s5834_s3 = inlined_call_operand.hbm [shape: bf16[384,128], index: 3, kind: input, shape index: {}]   ;;  %s5835_s4 = inlined_call_operand.vmem [shape: f32[1,128], index: 4, kind: input, shape index: {}]   ;;  %s5836_s5 = inlined_call_operand.hbm [shape: bf16[128,128], index: 5, kind: input, shape index: {}]   ;;  %s5837_s6 = inlined_call_operand.vmem [shape: f32[1,128], index: 6, kind: input, shape index: {}]   ;;  %s5838_s7 = inlined_call_operand.vmem [shape: f32[8,128], index: 7, kind: input, shape index: {}]   ;;  %s5839_s8 = inlined_call_operand.hbm [shape: f32[8,128], index: 8, kind: input, shape index: {}]   ;;  %s5840_s9 = inlined_call_operand.hbm [shape: bf16[8,64,128], index: 9, kind: output, shape index: {}]  }
   0x1   :  { %5847 = sst [smem:[#allocation16_spill]] %s5832_s1 }
   0x2   :  { %5848 = sst [smem:[#allocation17_spill]] %s5834_s3 }
   0x3   :  { %5849 = sst [smem:[#allocation18_spill]] %s5836_s5 }
   0x4   :  { %14 = vsyncpa [#allocation3], 0 }
   0x5   :  { %16 = vsyncpa [#allocation3 + $0x1], 0 }
   0x6   :  { %17 = vsyncpa [#allocation6], 0 }
   0x7   :  { %18 = vsyncpa [#allocation9], 0 }
   0x8   :  { %19 = vsyncpa [#allocation4], 0 }
   0x9   :  { %21 = vsyncpa [#allocation4 + $0x1], 0  ;;  %s4693_s30 = smov 0   ;;  %s4695_s10 = smov 0  }
   0xa   :  { %s4697_s11 = smov 0   ;;  %s4699_s12 = smov 0  }
   0xb LB: > { %s4714_s13 = sadd.s32 4294967295, %s4631_s12   ;;  %s3138_s14 = sadd.s32 4294967294, %s4631_s12   ;;  %s4631_s12 = sphi %s4699_s12, %s5875_s12   ;;  %s4627_s11 = sphi %s4697_s11, %s5874_s11   ;;  %s4623_s10 = sphi %s4695_s10, %s5873_s10   ;;  %s4619_s30 = sphi %s4693_s30, %s5872_s30  }
   0xc   : > { %p47_p0 = scmp.ne.s32.totalorder %s4623_s10, %s4619_s30  ;;  %p5841_p1 = scmp.eq.s32.totalorder %s4714_s13, 0 }
   0xd   : > { %p239_p2 = scmp.eq.s32.totalorder %s4714_s13, 1  ;;  %p245_p3 = scmp.eq.s32.totalorder %s3138_s14, 1 }
   0xe   : > { %p4723_p4 = por %p5841_p1, %p47_p0  ;;  %p3139_p5 = scmp.ge.s32.totalorder %s4631_s12, 1 }
   0xf   : > { %p4728_p6 = por %p245_p3, %p47_p0  ;;  %p252_p7 = scmp.lt.s32.totalorder %s4631_s12, 3 }
  0x10   : > { %s5850_s15 = scalar_select %p4723_p4, 1, 0 }
  0x11   : > { %s5851_s16 = scalar_select %p4728_p6, 1, 0 }
  0x12   : > { %p4733_p8 = pnand %p3139_p5, %p252_p7  ;;  %s4633_s18 = smov [#allocation5]  }
  0x13   : > { %s264_s19 = sshll.u32 %s4633_s18, 4  ;;  %s4634_s21 = smov [#allocation8]   ;;  %s265_s19 = int_to_ptr.vmem [resolvable:$true] %s264_s19 }
  0x14   : > { %s5852_s17 = scalar_select %p4733_p8, 1, 0 }
  0x15   : > { %p3852_p9 = pneg %p4733_p8  ;;  %s296_s22 = sshll.u32 %s4634_s21, 4  ;;  %s297_s22 = int_to_ptr.vmem [resolvable:$true] %s296_s22 }
  0x16   : > { %s4635_s23 = smov [#allocation7]   ;;  %s4438_s25 = scalar_lea.vmem %s265_s19, 1024 }
  0x17   : > { %p4742_p11 = pnand %p3852_p9, %p5841_p1  ;;  %s280_s24 = sshll.u32 %s4635_s23, 4  ;;  %s281_s24 = int_to_ptr.vmem [resolvable:$true] %s280_s24 }
  0x18   : > { %p4439_p13 = scmp.ne.s32.totalorder %s265_s19, %s4438_s25  ;;  %p4446_p5 = scmp.lt.s32.totalorder %s265_s19, %s265_s19 }
  0x19   : > { %p4429_p12 = pneg %p4742_p11  ;;  %p4447_p7 = scmp.lt.s32.totalorder %s4438_s25, %s4438_s25 }
  0x1b   : > { %p4441_p0 = pnand %p4439_p13, %p4429_p12  ;;  %p4448_p9 = por %p4447_p7, %p4446_p5 }
  0x1d   : > { %p4442_p3 = pneg %p4441_p0 }
  0x1f   : > { %p4449_p10 = pnand %p4448_p9, %p4442_p3 }
  0x21   : > { %4452 = shalt.err (!%p4449_p10)
}
  0x22   : > { %s5842_s26 = smov 64   ;;  %s5843_s27 = smov 4  }
  0x23   : > { %s5854_s1 = sld [smem:[#allocation16_spill]]  ;;  %s4464_s14 = scalar_lea.vmem %s297_s22, 1024 }
  0x24   : > { %p4465_p13 = scmp.ne.s32.totalorder %s297_s22, %s4464_s14  ;;  %p4472_p3 = scmp.lt.s32.totalorder %s297_s22, %s297_s22 }
  0x25   : > { %p4473_p10 = scmp.lt.s32.totalorder %s4464_s14, %s4464_s14 }
  0x26   : > { %p4467_p0 = pnand %p4465_p13, %p4429_p12 }
  0x27   : > { %p4474_p7 = por %p4473_p10, %p4472_p3 }
  0x28   : > { %p4468_p5 = pneg %p4467_p0 }
  0x29   : > { %3855 = dma.hbm_to_vmem [thread:$0]  (!%p4742_p11), %s5854_s1, 1024, %s265_s19, [#allocation6], %s5842_s26, %s5842_s26, %s5843_s27  }
  0x2a   : > { %p4475_p9 = pnand %p4474_p7, %p4468_p5 }
  0x2c   : > { %4478 = shalt.err (!%p4475_p9)
}
  0x2d   : > { %s5855_s5 = sld [smem:[#allocation18_spill]]  ;;  %s4490_s19 = scalar_lea.vmem %s281_s24, 3072 }
  0x2e   : > { %p4491_p1 = scmp.ne.s32.totalorder %s281_s24, %s4490_s19  ;;  %p4498_p3 = scmp.lt.s32.totalorder %s281_s24, %s281_s24 }
  0x2f   : > { %p4499_p5 = scmp.lt.s32.totalorder %s4490_s19, %s4490_s19 }
  0x30   : > { %p4493_p13 = pnand %p4491_p1, %p4429_p12 }
  0x31   : > { %p4500_p10 = por %p4499_p5, %p4498_p3 }
  0x32   : > { %p4494_p0 = pneg %p4493_p13 }
  0x33   : > { %3861 = dma.hbm_to_vmem [thread:$0]  (!%p4742_p11), %s5855_s5, 1024, %s297_s22, [#allocation9], %s5842_s26, %s5842_s26, %s5843_s27  }
  0x34   : > { %p4501_p7 = pnand %p4500_p10, %p4494_p0 }
  0x36   : > { %4504 = shalt.err (!%p4501_p7)
}
  0x37   : > { %s5856_s3 = sld [smem:[#allocation17_spill]]  ;;  %s4638_s22 = smov [#allocation10]  }
  0x38   : > { %s316_s28 = sshll.u32 %s4638_s22, 4  ;;  %s317_s28 = int_to_ptr.vmem [resolvable:$true] %s316_s28 }
  0x39   : > { %s4516_s29 = scalar_lea.vmem %s317_s28, 128  ;;  %p4524_p0 = scmp.lt.s32.totalorder %s317_s28, %s317_s28 }
  0x3a   : > { %p4517_p1 = scmp.ne.s32.totalorder %s317_s28, %s4516_s29  ;;  %p4525_p3 = scmp.lt.s32.totalorder %s4516_s29, %s4516_s29 }
  0x3c   : > { %p4519_p9 = pnand %p4517_p1, %p4429_p12  ;;  %p4526_p5 = por %p4525_p3, %p4524_p0 }
  0x3d   : > { %3858 = dma.hbm_to_vmem [thread:$0]  (!%p4742_p11), %s5856_s3, 3072, %s281_s24, [#allocation6], %s5842_s26, %s5842_s26, %s5843_s27  }
  0x3e   : > { %p4520_p13 = pneg %p4519_p9 }
  0x40   : > { %p4527_p10 = pnand %p4526_p5, %p4520_p13 }
  0x42   : > { %4530 = shalt.err (!%p4527_p10)
}
  0x43   : > { %3864 = dma.hbm_to_vmem [thread:$0]  (!%p4742_p11), %s5839_s8, 128, %s317_s28, [#allocation9]  }
  0x44   : > { %s4790_s24 = sadd.s32 1, %s4631_s12   ;;  %s34_s21 = sadd.s32 1, %s4627_s11 }
  0x45   : > { %s31_s20 = ssub.s32 %s4631_s12, %s4790_s24  ;;  %p41_p12 = scmp.ne.s32.totalorder %s4627_s11, %s4623_s10 }
  0x46   : > { %p32_p7 = scmp.eq.s32.totalorder %s31_s20, 0  ;;  %p42_p1 = scmp.eq.s32.totalorder %s4631_s12, 0 }
  0x47   : > { %p4800_p9 = por %p239_p2, %p41_p12  ;;  %p3877_p13 = scmp.lt.s32.totalorder %s4631_s12, 2 }
  0x48   : > { %s4806_s23 = scalar_select %p32_p7, %s4627_s11, %s34_s21  }
  0x49   : > { %s5857_s19 = scalar_select %p4800_p9, 1, 0 }
  0x4a   : > { %p43_p0 = por %p42_p1, %p41_p12  ;;  %s327_s25 = sand.u32 1, %s4627_s11  }
  0x4b   : > { %s3145_s22 = sshll.u32 %s327_s25, 7  ;;  %s3358_s28 = sshll.u32 %s4631_s12, 11 }
  0x4c   : > { %s4813_s18 = scalar_lea.hbm %s5831_s0, %s3358_s28  ;;  %s331_s20 = scalar_lea.vmem [#allocation2], %s3145_s22 }
  0x4d   : > { %s339_s26 = sshll.u32 %s331_s20, 4  ;;  %p4817_p2 = pnand %p3877_p13, %p43_p0  ;;  %s4815_s26 = int_to_ptr.vmem [resolvable:$true] %s339_s26 }
  0x4e   : > { %s4821_s21 = scalar_lea.sflag [#allocation3], %s327_s25  ;;  %s4531_s1 = scalar_lea.hbm %s4813_s18, 2048 }
  0x4f   : > { %p4532_p11 = scmp.ne.s32.totalorder %s4813_s18, %s4531_s1  ;;  %p4533_p3 = pneg %p4817_p2 }
  0x50   : > { %s4536_s22 = scalar_lea.hbm %s5831_s0, 4096  ;;  %p4537_p12 = scmp.lt.s32.totalorder %s4813_s18, %s5831_s0 }
  0x51   : > { %p4534_p5 = pnand %p4533_p3, %p4532_p11  ;;  %p4538_p7 = scmp.lt.s32.totalorder %s4536_s22, %s4531_s1 }
  0x53   : > { %p4535_p10 = pneg %p4534_p5  ;;  %p4539_p1 = por %p4538_p7, %p4537_p12 }
  0x55   : > { %p4540_p13 = pnand %p4539_p1, %p4535_p10 }
  0x57   : > { %4543 = shalt.err (!%p4540_p13)
}
  0x58   : > { %s4544_s25 = scalar_lea.vmem %s4815_s26, 2048  ;;  %s4639_s3 = smov [#allocation2]  }
  0x59   : > { %p4545_p0 = scmp.ne.s32.totalorder %s4815_s26, %s4544_s25  ;;  %s4549_s5 = sshll.u32 %s4639_s3, 4  ;;  %s4550_s5 = int_to_ptr.vmem [resolvable:$false] %s4549_s5 }
  0x5a   : > { %s4551_s28 = scalar_lea.vmem %s4550_s5, 4096  ;;  %p4552_p5 = scmp.lt.s32.totalorder %s4815_s26, %s4550_s5 }
  0x5b   : > { %p4547_p6 = pnand %p4545_p0, %p4533_p3  ;;  %p4553_p9 = scmp.lt.s32.totalorder %s4551_s28, %s4544_s25 }
  0x5d   : > { %p4548_p11 = pneg %p4547_p6  ;;  %p4554_p4 = por %p4553_p9, %p4552_p5 }
  0x5f   : > { %p4555_p8 = pnand %p4554_p4, %p4548_p11 }
  0x61   : > { %4558 = shalt.err (!%p4555_p8)
}
  0x62   : > { %s5859_s1 = smov 4   ;;  %s5860_s29 = smov 64  }
  0x63   : > { %3868 = dma.hbm_to_vmem [thread:$0]  (!%p4817_p2), %s4813_s18, 2048, %s4815_s26, %s4821_s21, %s5860_s29, %s5860_s29, %s5859_s1  }
  0x64   : > { %p5861_p6 = scmp.ne.s32.totalorder %s5852_s17, 0 }
  0x65   : > { %s4848_s3 = sand.u32 (!%p5861_p6), 1, %s4623_s10   ;;  %p5862_p4 = scmp.ne.s32.totalorder (!%p5861_p6), %s5850_s15, 0 }
  0x66   : > { %351 = sbr.rel (%p5861_p6) target bundleno = 1269 (0x4f5), region = 56  ;;  %s3150_s5 = sshll.u32 (!%p5861_p6), %s4848_s3, 7 }
  0x67   : > { %s354_s22 = scalar_lea.sflag (!%p5861_p6), [#allocation3], %s4848_s3  ;;  %s4854_s27 = scalar_lea.vmem (!%p5861_p6), [#allocation2], %s3150_s5 }
  0x6b   : > { %4602 = dma.done.wait (%p5862_p4), %s354_s22, 2048  }
  0x6c   : > { %4604 = vsyncadd (%p5862_p4), %s354_s22, 4294965248  ;;  %p5863_p8 = scmp.eq.s32.totalorder %s4714_s13, 0 }
  0x6e   : > { %4606 = dma.done.wait (%p5863_p8), [#allocation6], 4096   ;;  %p5864_p9 = pmov %p5863_p8 }
  0x6f   : > { %p5865_p2 = pmov %p5863_p8 }
  0x70   : > { %4608 = vsyncadd (%p5864_p9), [#allocation6], 4294963200 }
  0x71   : > { %4610 = dma.done.wait (%p5865_p2), [#allocation9], 1152   ;;  %p5866_p3 = pmov %p5865_p2 }
  0x72   : > { %v3923_v0 = vld [vmem:[#allocation5 + $0x38] sm:$0xff]   ;;  %v3924_v1 = vld [vmem:[#allocation5 + $0x30] sm:$0xff]   ;;  %v3925_v2 = vld [vmem:[#allocation5 + $0x28] sm:$0xff]   ;;  %vm1011_vm0 = vsmask.f32 256  ;;  %vm1156_vm1 = vcmask 1040384  }
  0x73   : > { %4612 = vsyncadd (%p5866_p3), [#allocation9], 4294966144  ;;  %3672 = vmatprep.subr.bf16.mxu0 %v3923_v0  ;;  %3816 = vmatprep.subr.bf16.mxu1 %v3923_v0  ;;  %v3926_v3 = vld [vmem:[#allocation5 + $0x20] sm:$0xff]   ;;  %v3927_v6 = vld [vmem:[#allocation5 + $0x18] sm:$0xff]   ;;  %vm1335_vm2 = vcmask 1046528   ;;  %s5665_s28 = scalar_lea.vmem [#allocation11], %s3150_s5 }
  0x74   : > { %3673 = vmatpush3.bf16.msra.mxu0 %v3923_v0  ;;  %3824 = vmatpush3.bf16.msra.mxu1 %v3923_v0  ;;  %v411_v4 = vld [vmem:[%s4854_s27] sm:$0xff]   ;;  %v3928_v7 = vld [vmem:[#allocation5 + $0x10] sm:$0xff]   ;;  %v3929_v8 = vld [vmem:[#allocation5 + $0x8] sm:$0xff]   ;;  %vm1166_vm4 = vsmask.f32 7424  ;;  %s3392_s1 = sshll.u32 %s4714_s13, 11 }
  0x75   : > { %3674 = vmatprep.subr.bf16.mxu0 %v3924_v1  ;;  %3817 = vmatprep.subr.bf16.mxu1 %v3924_v1  ;;  %v427_v5 = vld [vmem:[%s4854_s27 + $0x40] sm:$0xff]   ;;  %v413_v10 = vld [vmem:[%s4854_s27 + $0x8] sm:$0xff]   ;;  %v415_v12 = vld [vmem:[%s4854_s27 + $0x10] sm:$0xff]   ;;  %s3027_s29 = sshll.u32 %s5665_s28, 4  ;;  %s3013_s13 = scalar_lea.sflag [#allocation4], %s4848_s3  ;;  %s5786_s29 = int_to_ptr.vmem [resolvable:$true] %s3027_s29 }
  0x76   : > { %3688 = vmatprep.mubr.bf16.mxu0 %v411_v4  ;;  %3704 = vmatprep.mubr.bf16.mxu1 %v427_v5  ;;  %v3930_v9 = vld [vmem:[#allocation5] sm:$0xff]   ;;  %v429_v11 = vld [vmem:[%s4854_s27 + $0x48] sm:$0xff]   ;;  %v431_v13 = vld [vmem:[%s4854_s27 + $0x50] sm:$0xff]   ;;  %s4559_s15 = scalar_lea.vmem %s5786_s29, 2048  ;;  %p5869_p12 = scmp.ne.s32.totalorder %s5857_s19, 0 }
  0x77   : > { %v417_v14 = vld [vmem:[%s4854_s27 + $0x18] sm:$0xff]   ;;  %v419_v16 = vld [vmem:[%s4854_s27 + $0x20] sm:$0xff]   ;;  %v421_v18 = vld [vmem:[%s4854_s27 + $0x28] sm:$0xff]   ;;  %p4560_p10 = scmp.ne.s32.totalorder %s5786_s29, %s4559_s15  ;;  %s4640_s17 = smov [#allocation11]  }
  0x78   : > { %3675 = vmatpush3.bf16.msra.mxu0 %v3924_v1  ;;  %3825 = vmatpush3.bf16.msra.mxu1 %v3924_v1  ;;  %v433_v15 = vld [vmem:[%s4854_s27 + $0x58] sm:$0xff]   ;;  %v435_v17 = vld [vmem:[%s4854_s27 + $0x60] sm:$0xff]   ;;  %v437_v19 = vld [vmem:[%s4854_s27 + $0x68] sm:$0xff]   ;;  %s4563_s26 = sshll.u32 %s4640_s17, 4  ;;  %s4564_s26 = int_to_ptr.vmem [resolvable:$false] %s4563_s26 }
  0x79   : > { %3676 = vmatprep.subr.bf16.mxu0 %v3925_v2  ;;  %3818 = vmatprep.subr.bf16.mxu1 %v3925_v2  ;;  %v423_v20 = vld [vmem:[%s4854_s27 + $0x30] sm:$0xff]   ;;  %v425_v22 = vld [vmem:[%s4854_s27 + $0x38] sm:$0xff]   ;;  %v3952_v30 = vld [vmem:[#allocation7 + $0x68] sm:$0xff]   ;;  %p4561_p7 = pnand %p4560_p10, %p5869_p12  ;;  %s4565_s18 = scalar_lea.vmem %s4564_s26, 4096 }
  0x7a   : > { %v439_v21 = vld [vmem:[%s4854_s27 + $0x70] sm:$0xff]   ;;  %v441_v23 = vld [vmem:[%s4854_s27 + $0x78] sm:$0xff]   ;;  %v3954_v31 = vld [vmem:[#allocation7 + $0x28] sm:$0xff]   ;;  %p4566_p13 = scmp.lt.s32.totalorder %s5786_s29, %s4564_s26  ;;  %p4567_p0 = scmp.lt.s32.totalorder %s4565_s18, %s4559_s15 }
  0x7b   : > { %v3947_v24 = vld [vmem:[#allocation7 + $0x78] sm:$0xff]   ;;  %v3949_v27 = vld [vmem:[#allocation7 + $0x70] sm:$0xff]   ;;  %v3956_v32 = vld [vmem:[#allocation7 + $0xa8] sm:$0xff]   ;;  %p4562_p1 = pneg %p4561_p7 }
  0x7c   : > { %3677 = vmatpush3.bf16.msra.mxu0 %v3925_v2  ;;  %3826 = vmatpush3.bf16.msra.mxu1 %v3925_v2  ;;  %v3948_v25 = vld [vmem:[#allocation7 + $0x38] sm:$0xff]   ;;  %v3951_v28 = vld [vmem:[#allocation7 + $0x30] sm:$0xff]   ;;  %v3955_v33 = vld [vmem:[#allocation7 + $0x60] sm:$0xff]   ;;  %p4568_p11 = por %p4567_p0, %p4566_p13 }
  0x7d   : > { %3678 = vmatprep.subr.bf16.mxu0 %v3926_v3  ;;  %3819 = vmatprep.subr.bf16.mxu1 %v3926_v3  ;;  %v3950_v26 = vld [vmem:[#allocation7 + $0xb8] sm:$0xff]   ;;  %v3953_v29 = vld [vmem:[#allocation7 + $0xb0] sm:$0xff]   ;;  %v3957_v34 = vld [vmem:[#allocation7 + $0x20] sm:$0xff]  }
  0x7e   : > { %v3959_v35 = vld [vmem:[#allocation7 + $0xa0] sm:$0xff]   ;;  %v3958_v36 = vld [vmem:[#allocation7 + $0x58] sm:$0xff]   ;;  %v3961_v39 = vld [vmem:[#allocation7 + $0x50] sm:$0xff]   ;;  %p4569_p5 = pnand %p4568_p11, %p4562_p1 }
  0x7f   : > { %v3960_v37 = vld [vmem:[#allocation7 + $0x18] sm:$0xff]   ;;  %v3963_v40 = vld [vmem:[#allocation7 + $0x10] sm:$0xff]   ;;  %v3964_v42 = vld [vmem:[#allocation7 + $0x48] sm:$0xff]  }
  0x80   : > { %3679 = vmatpush3.bf16.msra.mxu0 %v3926_v3  ;;  %3827 = vmatpush3.bf16.msra.mxu1 %v3926_v3  ;;  %v3962_v38 = vld [vmem:[#allocation7 + $0x98] sm:$0xff]   ;;  %v3965_v41 = vld [vmem:[#allocation7 + $0x90] sm:$0xff]   ;;  %v3966_v43 = vld [vmem:[#allocation7 + $0x8] sm:$0xff]  }
  0x81   : > { %3680 = vmatprep.subr.bf16.mxu0 %v3927_v6  ;;  %3820 = vmatprep.subr.bf16.mxu1 %v3927_v6  ;;  %v3968_v44 = vld [vmem:[#allocation7 + $0x88] sm:$0xff]   ;;  %v3967_v45 = vld [vmem:[#allocation7 + $0x40] sm:$0xff]   ;;  %vm5036_vm3 = vmand %vm1156_vm1, %vm1011_vm0 }
  0x82   : > { %v3969_v46 = vld [vmem:[#allocation7] sm:$0xff]  }
  0x83   : > { %v3970_v47 = vld [vmem:[#allocation7 + $0x80] sm:$0xff]  }
  0x84   : > { %3681 = vmatpush3.bf16.msra.mxu0 %v3927_v6  ;;  %3828 = vmatpush3.bf16.msra.mxu1 %v3927_v6  ;;  %v4887_v48 = vld [vmem:[%s5833_s2] ss:$0 sm:$0xff] }
  0x85   : > { %3682 = vmatprep.subr.bf16.mxu0 %v3928_v7  ;;  %3821 = vmatprep.subr.bf16.mxu1 %v3928_v7 }
  0x88   : > { %3683 = vmatpush3.bf16.msra.mxu0 %v3928_v7  ;;  %3829 = vmatpush3.bf16.msra.mxu1 %v3928_v7 }
  0x89   : > { %3684 = vmatprep.subr.bf16.mxu0 %v3929_v8  ;;  %3822 = vmatprep.subr.bf16.mxu1 %v3929_v8 }
  0x8c   : > { %3685 = vmatpush3.bf16.msra.mxu0 %v3929_v8  ;;  %3830 = vmatpush3.bf16.msra.mxu1 %v3929_v8 }
  0x8d   : > { %3686 = vmatprep.subr.bf16.mxu0 %v3930_v9  ;;  %3823 = vmatprep.subr.bf16.mxu1 %v3930_v9 }
  0x90   : > { %3687 = vmatpush3.bf16.msra.mxu0 %v3930_v9  ;;  %3831 = vmatpush3.bf16.msra.mxu1 %v3930_v9 }
  0x91   : > { %3512 = vmatprep.subr.bf16.mxu1 %v3947_v24  ;;  %3720 = vmatprep.subr.bf16.mxu0 %v3950_v26 }
  0x93   : > { %3689 = vmatmul.mubr.bf16.vlgmr.msra.gmra.mxu0 %v413_v10  ;;  %3705 = vmatmul.mubr.bf16.vlgmr.msra.gmra.mxu1 %v429_v11 }
  0x94   : > { %3692 = vmatprep.mubr.bf16.mxu0 %v415_v12  ;;  %3708 = vmatprep.mubr.bf16.mxu1 %v431_v13 }
  0x95   : > { %3513 = vmatpush3.bf16.msra.mxu1 %v3948_v25  ;;  %3721 = vmatpush3.bf16.msra.mxu0 %v3950_v26 }
  0x96   : > { %3514 = vmatprep.subr.bf16.mxu1 %v3949_v27  ;;  %3722 = vmatprep.subr.bf16.mxu0 %v3953_v29 }
  0x99   : > { %3515 = vmatpush3.bf16.msra.mxu1 %v3951_v28  ;;  %3723 = vmatpush3.bf16.msra.mxu0 %v3953_v29 }
  0x9a   : > { %3516 = vmatprep.subr.bf16.mxu1 %v3952_v30  ;;  %3724 = vmatprep.subr.bf16.mxu0 %v3956_v32 }
  0x9b   : > { %3693 = vmatmul.mubr.bf16.gmra.mxu0 %v417_v14  ;;  %3709 = vmatmul.mubr.bf16.gmra.mxu1 %v433_v15 }
  0x9c   : > { %3696 = vmatprep.mubr.bf16.mxu0 %v419_v16  ;;  %3712 = vmatprep.mubr.bf16.mxu1 %v435_v17 }
  0x9d   : > { %3517 = vmatpush3.bf16.msra.mxu1 %v3954_v31  ;;  %3725 = vmatpush3.bf16.msra.mxu0 %v3956_v32 }
  0x9e   : > { %3518 = vmatprep.subr.bf16.mxu1 %v3955_v33  ;;  %3726 = vmatprep.subr.bf16.mxu0 %v3959_v35 }
  0xa1   : > { %3519 = vmatpush3.bf16.msra.mxu1 %v3957_v34  ;;  %3727 = vmatpush3.bf16.msra.mxu0 %v3959_v35 }
  0xa2   : > { %3520 = vmatprep.subr.bf16.mxu1 %v3958_v36  ;;  %3728 = vmatprep.subr.bf16.mxu0 %v3962_v38 }
  0xa3   : > { %3697 = vmatmul.mubr.bf16.gmra.mxu0 %v421_v18  ;;  %3713 = vmatmul.mubr.bf16.gmra.mxu1 %v437_v19 }
  0xa4   : > { %3700 = vmatprep.mubr.bf16.mxu0 %v423_v20  ;;  %3716 = vmatprep.mubr.bf16.mxu1 %v439_v21 }
  0xa5   : > { %3521 = vmatpush3.bf16.msra.mxu1 %v3960_v37  ;;  %3729 = vmatpush3.bf16.msra.mxu0 %v3962_v38 }
  0xa6   : > { %3522 = vmatprep.subr.bf16.mxu1 %v3961_v39  ;;  %3730 = vmatprep.subr.bf16.mxu0 %v3965_v41 }
  0xa9   : > { %3523 = vmatpush3.bf16.msra.mxu1 %v3963_v40  ;;  %3731 = vmatpush3.bf16.msra.mxu0 %v3965_v41 }
  0xaa   : > { %3524 = vmatprep.subr.bf16.mxu1 %v3964_v42  ;;  %3732 = vmatprep.subr.bf16.mxu0 %v3968_v44 }
  0xab   : > { %3701 = vmatmul.mubr.bf16.gmra.mxu0 %v425_v22  ;;  %3717 = vmatmul.mubr.bf16.gmra.mxu1 %v441_v23 }
  0xad   : > { %3525 = vmatpush3.bf16.msra.mxu1 %v3966_v43  ;;  %3733 = vmatpush3.bf16.msra.mxu0 %v3968_v44 }
  0xae   : > { %3526 = vmatprep.subr.bf16.mxu1 %v3967_v45  ;;  %3734 = vmatprep.subr.bf16.mxu0 %v3970_v47 }
  0xb1   : > { %3527 = vmatpush3.bf16.msra.mxu1 %v3969_v46  ;;  %3735 = vmatpush3.bf16.msra.mxu0 %v3970_v47 }
 0x153   : > { %v3690_v49 = vpop.f32.mrf.mxu0  ;;  %v3706_v50 = vpop.f32.mrf.mxu1 }
 0x154   : > { %v4890_v51 = vadd.f32 %v3690_v49, %v4887_v48  ;;  %v4897_v57 = vadd.f32 %v3706_v50, %v4887_v48 }
 0x155   : > { %v644_v52 = vpop.f32.mrf.mxu0  ;;  %v708_v53 = vpop.f32.mrf.mxu1 }
 0x156   : > { %v3183_v54 = vmul.f32 -1.442695, %v4890_v51  ;;  %v4894_v55 = vadd.f32 %v4887_v48, %v644_v52  ;;  %v4904_v62 = vadd.f32 %v4887_v48, %v708_v53  ;;  %v3199_v3 = vmul.f32 -1.442695, %v4897_v57 }
 0x157   : > { %v3691_v56 = vpop.f32.mrf.mxu0  ;;  %v3707_v58 = vpop.f32.mrf.mxu1 }
 0x158   : > { %3995 = vpow2.f32 %v3183_v54  ;;  %v3181_v59 = vmul.f32 -1.442695, %v4894_v55  ;;  %v4901_v60 = vadd.f32 %v3691_v56, %v4887_v48  ;;  %v4912_v4 = vadd.f32 %v3707_v58, %v4887_v48 }
 0x159   : > { %v647_v61 = vpop.f32.mrf.mxu0  ;;  %v711_v63 = vpop.f32.mrf.mxu1  ;;  %v3197_v9 = vmul.f32 -1.442695, %v4904_v62 }
 0x15a   : > { %3997 = vpow2.f32 %v3181_v59  ;;  %v3184_v0 = vmul.f32 -1.442695, %v4901_v60  ;;  %v4908_v1 = vadd.f32 %v4887_v48, %v647_v61  ;;  %v4920_v10 = vadd.f32 %v4887_v48, %v711_v63 }
 0x15b   : > { %v3694_v2 = vpop.f32.mrf.mxu0  ;;  %v3710_v5 = vpop.f32.mrf.mxu1  ;;  %v3200_v15 = vmul.f32 -1.442695, %v4912_v4 }
 0x15c   : > { %3999 = vpow2.f32 %v3184_v0  ;;  %v3182_v6 = vmul.f32 -1.442695, %v4908_v1  ;;  %v4916_v7 = vadd.f32 %v3694_v2, %v4887_v48  ;;  %v4928_v16 = vadd.f32 %v3710_v5, %v4887_v48 }
 0x15d   : > { %v660_v8 = vpop.f32.mrf.mxu0  ;;  %v724_v11 = vpop.f32.mrf.mxu1  ;;  %v3198_v21 = vmul.f32 -1.442695, %v4920_v10 }
 0x15e   : > { %4001 = vpow2.f32 %v3182_v6  ;;  %v3187_v12 = vmul.f32 -1.442695, %v4916_v7  ;;  %v4924_v13 = vadd.f32 %v4887_v48, %v660_v8  ;;  %v4935_v19 = vadd.f32 %v4887_v48, %v724_v11 }
 0x15f   : > { %v3695_v14 = vpop.f32.mrf.mxu0  ;;  %4003 = vpow2.f32 %v3199_v3  ;;  %v3711_v22 = vpop.f32.mrf.mxu1  ;;  %v3203_v26 = vmul.f32 -1.442695, %v4928_v16 }
 0x160   : > { %4005 = vpow2.f32 %v3187_v12  ;;  %v3185_v17 = vmul.f32 -1.442695, %v4924_v13  ;;  %v4932_v18 = vadd.f32 %v3695_v14, %v4887_v48  ;;  %v3201_v29 = vmul.f32 -1.442695, %v4935_v19 }
 0x161   : > { %v663_v20 = vpop.f32.mrf.mxu0  ;;  %4007 = vpow2.f32 %v3197_v9  ;;  %v4949_v32 = vadd.f32 %v3711_v22, %v4887_v48  ;;  %v727_v33 = vpop.f32.mrf.mxu1 }
 0x162   : > { %4009 = vpow2.f32 %v3185_v17  ;;  %v3188_v23 = vmul.f32 -1.442695, %v4932_v18  ;;  %v4940_v24 = vadd.f32 %v4887_v48, %v663_v20  ;;  %v4956_v40 = vadd.f32 %v4887_v48, %v727_v33 }
 0x163   : > { %v3698_v25 = vpop.f32.mrf.mxu0  ;;  %4011 = vpow2.f32 %v3200_v15  ;;  %v4958_v41 = vpop.f32.mrf.mxu1  ;;  %v3204_v44 = vmul.f32 -1.442695, %v4949_v32 }
 0x164   : > { %4013 = vpow2.f32 %v3188_v23  ;;  %v3186_v27 = vmul.f32 -1.442695, %v4940_v24  ;;  %v4945_v28 = vadd.f32 %v3698_v25, %v4887_v48  ;;  %v3202_v54 = vmul.f32 -1.442695, %v4956_v40 }
 0x165   : > { %v3996_v30 = vpop.eup %3995  ;;  %v676_v31 = vpop.f32.mrf.mxu0  ;;  %4015 = vpow2.f32 %v3198_v21 }
 0x166   : > { %v869_v34 = vadd.f32 1.0, %v3996_v30  ;;  %4017 = vpow2.f32 %v3186_v27  ;;  %v3191_v36 = vmul.f32 -1.442695, %v4945_v28  ;;  %v4953_v37 = vadd.f32 %v4887_v48, %v676_v31  ;;  %v740_v56 = vpop.f32.mrf.mxu1 }
 0x167   : > { %v3998_v35 = vpop.eup %3997  ;;  %v3699_v38 = vpop.f32.mrf.mxu0  ;;  %4019 = vpow2.f32 %v3203_v26 }
 0x168   : > { %v867_v39 = vadd.f32 1.0, %v3998_v35  ;;  %4021 = vpow2.f32 %v3201_v29  ;;  %v3189_v47 = vmul.f32 -1.442695, %v4953_v37  ;;  %v4963_v49 = vadd.f32 %v3699_v38, %v4887_v48  ;;  %v3715_v8 = vpop.f32.mrf.mxu1 }
 0x169   : > { %v4000_v42 = vpop.eup %3999  ;;  %4023 = vrcp.f32 %v869_v34  ;;  %v679_v43 = vpop.f32.mrf.mxu0 }
 0x16a   : > { %4025 = vrcp.f32 %v867_v39  ;;  %v870_v45 = vadd.f32 1.0, %v4000_v42  ;;  %v3192_v0 = vmul.f32 -1.442695, %v4963_v49  ;;  %v4968_v2 = vadd.f32 %v4887_v48, %v679_v43  ;;  %v743_v27 = vpop.f32.mrf.mxu1 }
 0x16b   : > { %v4002_v46 = vpop.eup %4001  ;;  %4027 = vpow2.f32 %v3191_v36  ;;  %v3702_v53 = vpop.f32.mrf.mxu0  ;;  %v4984_v43 = vadd.f32 %v4958_v41, %v4887_v48  ;;  %v4999_v41 = vadd.f32 %v4887_v48, %v743_v27 }
 0x16c   : > { %v4004_v50 = vpop.eup %4003  ;;  %4029 = vrcp.f32 %v870_v45  ;;  %v868_v52 = vadd.f32 1.0, %v4002_v46  ;;  %v4971_v12 = vadd.f32 %v3702_v53, %v4887_v48  ;;  %v3190_v20 = vmul.f32 -1.442695, %v4968_v2  ;;  %v3718_v38 = vpop.f32.mrf.mxu1 }
 0x16d   : > { %v4006_v58 = vpop.eup %4005  ;;  %4031 = vpow2.f32 %v3204_v44  ;;  %v692_v6 = vpop.f32.mrf.mxu0  ;;  %v885_v11 = vadd.f32 1.0, %v4004_v50  ;;  %v4987_v44 = vadd.f32 %v4887_v48, %v740_v56 }
 0x16e   : > { %v4008_v59 = vpop.eup %4007  ;;  %4033 = vrcp.f32 %v868_v52  ;;  %v873_v61 = vadd.f32 1.0, %v4006_v58  ;;  %v4975_v25 = vadd.f32 %v4887_v48, %v692_v6  ;;  %v3195_v30 = vmul.f32 -1.442695, %v4971_v12 }
 0x16f   : > { %v4010_v63 = vpop.eup %4009  ;;  %4035 = vpow2.f32 %v3189_v47  ;;  %v3703_v26 = vpop.f32.mrf.mxu0  ;;  %v883_v50 = vadd.f32 1.0, %v4008_v59  ;;  %v4992_v52 = vadd.f32 %v3715_v8, %v4887_v48 }
 0x170   : > { %v4012_v3 = vpop.eup %4011  ;;  %v871_v5 = vadd.f32 1.0, %v4010_v63  ;;  %4037 = vpow2.f32 %v3202_v54  ;;  %v3193_v35 = vmul.f32 -1.442695, %v4975_v25  ;;  %v4980_v42 = vadd.f32 %v3703_v26, %v4887_v48 }
 0x171   : > { %v4014_v9 = vpop.eup %4013  ;;  %4039 = vrcp.f32 %v873_v61  ;;  %v886_v23 = vadd.f32 1.0, %v4012_v3  ;;  %v695_v36 = vpop.f32.mrf.mxu0 }
 0x172   : > { %v4016_v14 = vpop.eup %4015  ;;  %4041 = vrcp.f32 %v871_v5  ;;  %v874_v15 = vadd.f32 1.0, %v4014_v9  ;;  %v4996_v61 = vadd.f32 %v4887_v48, %v695_v36  ;;  %v3196_v3 = vmul.f32 -1.442695, %v4980_v42 }
 0x173   : > { %v4018_v17 = vpop.eup %4017  ;;  %4043 = vpow2.f32 %v3192_v0  ;;  %v884_v58 = vadd.f32 1.0, %v4016_v14  ;;  %v3207_v9 = vmul.f32 -1.442695, %v4984_v43  ;;  %v3205_v14 = vmul.f32 -1.442695, %v4987_v44 }
 0x174   : > { %v4020_v21 = vpop.eup %4019  ;;  %4045 = vrcp.f32 %v874_v15  ;;  %v872_v22 = vadd.f32 1.0, %v4018_v17  ;;  %v3208_v15 = vmul.f32 -1.442695, %v4992_v52 }
 0x175   : > { %v4022_v29 = vpop.eup %4021  ;;  %4047 = vrcp.f32 %v885_v11 }
 0x176   : > { %v4024_v31 = vpop.eup %4023  ;;  %4049 = vrcp.f32 %v872_v22  ;;  %v3194_v22 = vmul.f32 -1.442695, %v4996_v61  ;;  %v887_v36 = vadd.f32 1.0, %v4022_v29 }
 0x177   : > { %v4026_v33 = vpop.eup %4025  ;;  %4051 = vpow2.f32 %v3190_v20  ;;  %v965_v46 = vmul.f32 %v4024_v31, %v4890_v51  ;;  %v889_v31 = vadd.f32 1.0, %v4020_v21 }
 0x178   : > { %v4028_v34 = vpop.eup %4027  ;;  %4053 = vrcp.f32 %v886_v23  ;;  %v963_v54 = vmul.f32 %v4026_v33, %v4894_v55  ;;  %v5006_v55 = vadd.f32 %v3718_v38, %v4887_v48  ;;  %v5013_v23 = vmul.f32 -1.442695, %v4999_v41 }
 0x179   : > { %v4030_v39 = vpop.eup %4029  ;;  %4055 = vpow2.f32 %v3195_v30  ;;  %v877_v0 = vadd.f32 1.0, %v4028_v34 }
 0x17a   : > { %v4032_v45 = vpop.eup %4031  ;;  %v966_v47 = vmul.f32 %v4030_v39, %v4901_v60  ;;  %4057 = vpow2.f32 %v3193_v35  ;;  %v756_v60 = vpop.f32.mrf.mxu1  ;;  %v5016_v33 = vmul.f32 -1.442695, %v5006_v55 }
 0x17b   : > { %v4034_v53 = vpop.eup %4033  ;;  %4059 = vrcp.f32 %v883_v50  ;;  %v5020_v38 = vadd.f32 %v4887_v48, %v756_v60 }
 0x17c   : > { %v4036_v56 = vpop.eup %4035  ;;  %v996_v63 = vpack.c.bf16 %v966_v47, %v965_v46  ;;  %v964_v51 = vmul.f32 %v4034_v53, %v4908_v1  ;;  %4061 = vrcp.f32 %v884_v58  ;;  %v3719_v26 = vpop.f32.mrf.mxu1 }
 0x17d   : > { %v5002_v59 = vpop.eup %4037  ;;  %v875_v8 = vadd.f32 1.0, %v4036_v56  ;;  %4063 = vrcp.f32 %v877_v0  ;;  %v5024_v50 = vadd.f32 %v3719_v26, %v4887_v48  ;;  %v890_v0 = vadd.f32 1.0, %v4032_v45 }
 0x17e   : > { %v4040_v5 = vpop.eup %4039  ;;  %v995_v6 = vpack.c.bf16 %v964_v51, %v963_v54  ;;  %v1020_v1 = vshrl.u32 %v996_v63, 16  ;;  %4065 = vpow2.f32 %v3196_v3  ;;  %v1023_v56 = vshll.u32 %v996_v63, 16 }
 0x17f   : > { %v4042_v11 = vpop.eup %4041  ;;  %4067 = vrcp.f32 %v875_v8  ;;  %v969_v47 = vmul.f32 %v4040_v5, %v4916_v7 }
 0x180   : > { %v4044_v17 = vpop.eup %4043  ;;  %v1013_v20 = vshrl.u32 %v995_v6, 16  ;;  %v1022_v46 = vrot.slane %v1020_v1, 7  ;;  %v967_v54 = vmul.f32 %v4042_v11, %v4924_v13  ;;  %v1016_v7 = vshll.u32 %v995_v6, 16 }
 0x181   : > { %v4046_v27 = vpop.eup %4045  ;;  %v878_v30 = vadd.f32 1.0, %v4044_v17  ;;  %v3209_v1 = vmul.f32 -1.442695, %v5020_v38 }
 0x182   : > { %v4048_v34 = vpop.eup %4047  ;;  %v970_v35 = vmul.f32 %v4046_v27, %v4932_v18  ;;  %v1015_v53 = vrot.slane %v1013_v20, 7  ;;  %v759_v18 = vpop.f32.mrf.mxu1  ;;  %v1025_v8 = vor.u32 %v1023_v56, %v1022_v46  ;;  %v3212_v20 = vmul.f32 -1.442695, %v5024_v50 }
 0x183   : > { %v4050_v39 = vpop.eup %4049  ;;  %4069 = vrcp.f32 %v878_v30  ;;  %v5030_v13 = vadd.f32 %v4887_v48, %v759_v18  ;;  %v981_v45 = vmul.f32 %v4048_v34, %v4897_v57  ;;  %v888_v57 = vadd.f32 1.0, %v5002_v59 }
 0x184   : > { %v4052_v21 = vpop.eup %4051  ;;  %v968_v58 = vmul.f32 %v4050_v39, %v4940_v24  ;;  %4071 = vpow2.f32 %v3194_v22  ;;  %v998_v3 = vpack.c.bf16 %v970_v35, %v969_v47  ;;  %v1018_v24 = vor.u32 %v1016_v7, %v1015_v53 }
 0x185   : > { %v4054_v29 = vpop.eup %4053  ;;  %v876_v51 = vadd.f32 1.0, %v4052_v21  ;;  %4073 = vpow2.f32 %v3207_v9  ;;  %v3210_v35 = vmul.f32 -1.442695, %v5030_v13 }
 0x186   : > { %v4056_v60 = vpop.eup %4055  ;;  %v997_v5 = vpack.c.bf16 %v968_v58, %v967_v54  ;;  %4075 = vrcp.f32 %v889_v31  ;;  %v982_v9 = vmul.f32 %v4054_v29, %v4912_v4  ;;  %v1036_v48 = vshrl.u32 %v998_v3, 16 }
 0x187   : > { %4077 = vrcp.f32 %v876_v51  ;;  %v881_v17 = vadd.f32 1.0, %v4056_v60  ;;  %v4058_v63 = vpop.eup %4057  ;;  %v5045_v4 = vsel %vm1011_vm0, %v1015_v53, %v1025_v8  ;;  %v1158_v34 = vsel %vm5036_vm3, 0, %v1018_v24 }
 0x188   : > { %v1028_v11 = vshrl.u32 %v997_v5, 16  ;;  %4079 = vrcp.f32 %v887_v36  ;;  %v1031_v26 = vshll.u32 %v997_v5, 16  ;;  %v4060_v27 = vpop.eup %4059  ;;  %v879_v30 = vadd.f32 1.0, %v4058_v63 }
 0x189   : > { %4081 = vpow2.f32 %v3205_v14  ;;  %v4062_v14 = vpop.eup %4061  ;;  %v5051_v39 = vpack.c.bf16 %v982_v9, %v981_v45  ;;  %v1336_v59 = vrot.slane %v1158_v34, 1  ;;  %v5055_v21 = vrot.slane %v1036_v48, 7 }
 0x18a   : > { %v5041_v22 = vrot.slane %v1028_v11, 7  ;;  %4083 = vrcp.f32 %v890_v0  ;;  %v4064_v36 = vpop.eup %4063  ;;  %v1170_v54 = vshll.u32 %v1158_v34, 16  ;;  %v1039_v18 = vshll.u32 %v998_v3, 16 }
 0x18b   : > { %4085 = vpow2.f32 %v3208_v15  ;;  %v1337_v15 = vrot.slane %v5045_v4, 1  ;;  %v4066_v47 = vpop.eup %4065  ;;  %v1175_v60 = vshll.u32 %v5045_v4, 16 }
 0x18c   : > { %v1033_v31 = vor.u32 %v1031_v26, %v5041_v22  ;;  %4087 = vrcp.f32 %v881_v17  ;;  %v4068_v58 = vpop.eup %4067  ;;  %v882_v29 = vadd.f32 1.0, %v4066_v47  ;;  %v1172_v0 = vrot.slane %v1170_v54, 1 }
 0x18d   : > { %4089 = vpow2.f32 %v5013_v23  ;;  %v1338_v56 = vsel %vm1335_vm2, %v1336_v59, %v1337_v15  ;;  %v1168_v23 = vshrl.u32 %v1158_v34, 16  ;;  %v1041_v8 = vor.u32 %v1039_v18, %v5055_v21 }
 0x18e   : > { %v5058_v53 = vsel %vm1011_vm0, %v1022_v46, %v1033_v31  ;;  %4091 = vpow2.f32 %v5016_v33  ;;  %3736 = vmatprep.mubr.bf16.mxu0 %v1338_v56  ;;  %v973_v46 = vmul.f32 %v4064_v36, %v4945_v28  ;;  %v980_v28 = vmul.f32 %v4062_v14, %v4920_v10 }
 0x18f   : > { %4093 = vrcp.f32 %v879_v30  ;;  %v1339_v33 = vrot.slane %v5058_v53, 1  ;;  %v1173_v11 = vor.u32 %v1172_v0, %v1168_v23  ;;  %v971_v30 = vmul.f32 %v4068_v58, %v4953_v37 }
 0x190   : > { %v4070_v51 = vpop.eup %4069  ;;  %4095 = vpow2.f32 %v3209_v1  ;;  %v979_v1 = vmul.f32 %v4060_v27, %v4904_v62  ;;  %v5078_v10 = vsel %vm1011_vm0, %v5041_v22, %v1041_v8  ;;  %v1183_v58 = vshll.u32 %v5058_v53, 16 }
 0x191   : > { %v4072_v7 = vpop.eup %4071  ;;  %v974_v5 = vmul.f32 %v4070_v51, %v4963_v49  ;;  %4097 = vrcp.f32 %v882_v29  ;;  %v1177_v49 = vrot.slane %v1175_v60, 1  ;;  %v1340_v48 = vsel %vm1335_vm2, %v1337_v15, %v1339_v33 }
 0x192   : > { %v4074_v3 = vpop.eup %4073  ;;  %v880_v24 = vadd.f32 1.0, %v4072_v7  ;;  %4099 = vpow2.f32 %v3212_v20  ;;  %v1082_v20 = vshrl.u32 %v5051_v39, 16  ;;  %3737 = vmatmul.mubr.bf16.vlgmr.msra.gmra.mxu0 %v1340_v48  ;;  %v1341_v54 = vrot.slane %v5078_v10, 1 }
 0x193   : > { %v4076_v17 = vpop.eup %4075  ;;  %v1000_v63 = vpack.c.bf16 %v974_v5, %v973_v46  ;;  %4101 = vrcp.f32 %v888_v57  ;;  %v893_v45 = vadd.f32 1.0, %v4074_v3  ;;  %v1178_v57 = vsel %vm1166_vm4, %v1173_v11, %v1177_v49 }
 0x194   : > { %v4078_v9 = vpop.eup %4077  ;;  %4103 = vrcp.f32 %v880_v24  ;;  %1619 = vmatprep.mubr.bf16.mxu1 %v1178_v57  ;;  %v5091_v51 = vmul.f32 %v4076_v17, %v4928_v16  ;;  %v1342_v60 = vsel %vm1335_vm2, %v1339_v33, %v1341_v54  ;;  %v1185_v3 = vrot.slane %v1183_v58, 1 }
 0x195   : > { %v5070_v26 = vpop.eup %4079  ;;  %v1051_v31 = vshrl.u32 %v1000_v63, 16  ;;  %v972_v36 = vmul.f32 %v4078_v9, %v4968_v2  ;;  %v1054_v27 = vshll.u32 %v1000_v63, 16  ;;  %4105 = vpow2.f32 %v3210_v35  ;;  %1620 = vmatmul.mubr.bf16.vlgmr.msra.gmra.mxu1 %v1158_v34  ;;  %3740 = vmatprep.mubr.bf16.mxu0 %v1342_v60 }
 0x196   : > { %v4082_v62 = vpop.eup %4081  ;;  %4107 = vrcp.f32 %v893_v45  ;;  %v5084_v2 = vpack.c.bf16 %v980_v28, %v979_v1  ;;  %v1179_v35 = vshrl.u32 %v5045_v4, 16  ;;  %v1187_v8 = vshrl.u32 %v5058_v53, 16 }
 0x197   : > { %v5080_v14 = vpop.eup %4083  ;;  %v5082_v59 = vrot.slane %v1051_v31, 7  ;;  %v999_v37 = vpack.c.bf16 %v972_v36, %v971_v30  ;;  %v891_v15 = vadd.f32 1.0, %v4082_v62  ;;  %v1191_v1 = vshll.u32 %v5078_v10, 16 }
 0x198   : > { %v4086_v47 = vpop.eup %4085  ;;  %v1181_v34 = vor.u32 %v1179_v35, %v1177_v49  ;;  %v1162_v16 = vsel %vm5036_vm3, %v5055_v21, 0  ;;  %v1189_v45 = vor.u32 %v1187_v8, %v1185_v3 }
 0x199   : > { %v4088_v22 = vpop.eup %4087  ;;  %v1056_v18 = vor.u32 %v1054_v27, %v5082_v59  ;;  %v1044_v29 = vshrl.u32 %v999_v37, 16  ;;  %v1047_v56 = vshll.u32 %v999_v37, 16  ;;  %4109 = vrcp.f32 %v891_v15 }
 0x19a   : > { %v4090_v23 = vpop.eup %4089  ;;  %v894_v0 = vadd.f32 1.0, %v4086_v47  ;;  %v1186_v33 = vsel %vm1166_vm4, %v1181_v34, %v1185_v3  ;;  %v1193_v49 = vrot.slane %v1191_v1, 1  ;;  %v1343_v48 = vrot.slane %v1162_v16, 1 }
 0x19b   : > { %v4092_v7 = vpop.eup %4091  ;;  %v1046_v46 = vrot.slane %v1044_v29, 7  ;;  %v892_v5 = vadd.f32 1.0, %v4090_v23  ;;  %1627 = vmatprep.mubr.bf16.mxu1 %v1186_v33  ;;  %v977_v31 = vmul.f32 %v4088_v22, %v4971_v12  ;;  %v1075_v29 = vshrl.u32 %v5084_v2, 16 }
 0x19c   : > { %v4094_v24 = vpop.eup %4093  ;;  %4111 = vrcp.f32 %v894_v0  ;;  %v897_v11 = vadd.f32 1.0, %v4092_v7  ;;  %v1194_v15 = vsel %vm1166_vm4, %v1189_v45, %v1193_v49  ;;  %v1344_v47 = vsel %vm1335_vm2, %v1341_v54, %v1343_v48 }
 0x19d   : > { %v4096_v17 = vpop.eup %4095  ;;  %v1049_v63 = vor.u32 %v1047_v56, %v1046_v46  ;;  %4113 = vrcp.f32 %v892_v5  ;;  %v5103_v62 = vsel %vm1011_vm0, %v1046_v46, %v1056_v18  ;;  %v975_v57 = vmul.f32 %v4094_v24, %v4975_v25  ;;  %1628 = vmatmul.mubr.bf16.gmra.mxu1 %v5045_v4  ;;  %3741 = vmatmul.mubr.bf16.gmra.mxu0 %v1344_v47 }
 0x19e   : > { %v4098_v9 = vpop.eup %4097  ;;  %4115 = vrcp.f32 %v897_v11  ;;  %v895_v28 = vadd.f32 1.0, %v4096_v17  ;;  %1635 = vmatprep.mubr.bf16.mxu1 %v1194_v15  ;;  %v1346_v58 = vrot.slane %v5103_v62, 1  ;;  %v1195_v25 = vshrl.u32 %v5078_v10, 16 }
 0x19f   : > { %v4100_v30 = vpop.eup %4099  ;;  %v978_v36 = vmul.f32 %v4098_v9, %v4980_v42  ;;  %v5107_v21 = vsel %vm5036_vm3, 0, %v1049_v63  ;;  %v1199_v18 = vshll.u32 %v1162_v16, 16  ;;  %v986_v54 = vmul.f32 %v5080_v14, %v4949_v32 }
 0x1a0   : > { %v4102_v27 = vpop.eup %4101  ;;  %v898_v37 = vadd.f32 1.0, %v4100_v30  ;;  %4117 = vrcp.f32 %v895_v28  ;;  %v1345_v42 = vrot.slane %v5107_v21, 1  ;;  %v1206_v7 = vshll.u32 %v5107_v21, 16 }
 0x1a1   : > { %v4104_v12 = vpop.eup %4103  ;;  %v1002_v35 = vpack.c.bf16 %v978_v36, %v977_v31  ;;  %v983_v46 = vmul.f32 %v5070_v26, %v4935_v19  ;;  %v984_v8 = vmul.f32 %v4102_v27, %v4956_v40  ;;  %v1085_v32 = vshll.u32 %v5051_v39, 16 }
 0x1a2   : > { %v976_v22 = vmul.f32 %v4104_v12, %v4996_v61  ;;  %4119 = vrcp.f32 %v898_v37  ;;  %v4106_v4 = vpop.eup %4105  ;;  %v1347_v23 = vsel %vm1335_vm2, %v1345_v42, %v1346_v58  ;;  %v1197_v61 = vor.u32 %v1195_v25, %v1193_v49 }
 0x1a3   : > { %v1067_v56 = vshrl.u32 %v1002_v35, 16  ;;  %v4108_v0 = vpop.eup %4107  ;;  %v896_v34 = vadd.f32 1.0, %v4106_v4  ;;  %3744 = vmatprep.mubr.bf16.mxu0 %v1347_v23  ;;  %v1070_v3 = vshll.u32 %v1002_v35, 16  ;;  %v1201_v24 = vrot.slane %v1199_v18, 1 }
 0x1a4   : > { %v1001_v60 = vpack.c.bf16 %v976_v22, %v975_v57  ;;  %v5130_v1 = vrot.slane %v1082_v20, 7  ;;  %v5133_v16 = vpack.c.bf16 %v986_v54, %v5091_v51  ;;  %v989_v19 = vmul.f32 %v4108_v0, %v4984_v43 }
 0x1a5   : > { %v1069_v5 = vrot.slane %v1067_v56, 7  ;;  %4121 = vrcp.f32 %v896_v34  ;;  %1636 = vmatmul.mubr.bf16.gmra.mxu1 %v5058_v53  ;;  %v1202_v40 = vsel %vm1166_vm4, %v1197_v61, %v1201_v24  ;;  %v1208_v33 = vrot.slane %v1206_v7, 1 }
 0x1a6   : > { %v1059_v14 = vshrl.u32 %v1001_v60, 16  ;;  %v4110_v11 = vpop.eup %4109  ;;  %v1062_v63 = vshll.u32 %v1001_v60, 16  ;;  %v1077_v9 = vrot.slane %v1075_v29, 7  ;;  %v1078_v28 = vshll.u32 %v5084_v2, 16  ;;  %1643 = vmatprep.mubr.bf16.mxu1 %v1202_v40 }
 0x1a7   : > { %v1072_v17 = vor.u32 %v1070_v3, %v1069_v5  ;;  %v1005_v39 = vpack.c.bf16 %v984_v8, %v983_v46  ;;  %v1204_v20 = vshrl.u32 %v5107_v21, 16  ;;  %v1211_v53 = vshll.u32 %v5103_v62, 16 }
 0x1a8   : > { %v1061_v26 = vrot.slane %v1059_v14, 7  ;;  %v1098_v31 = vshrl.u32 %v5133_v16, 16  ;;  %v987_v36 = vmul.f32 %v4110_v11, %v4987_v44  ;;  %v1087_v27 = vor.u32 %v1085_v32, %v5130_v1 }
 0x1a9   : > { %v4112_v45 = vpop.eup %4111  ;;  %v1080_v15 = vor.u32 %v1078_v28, %v1077_v9  ;;  %v1090_v47 = vshrl.u32 %v1005_v39, 16  ;;  %v1101_v22 = vshll.u32 %v5133_v16, 16  ;;  %v1213_v25 = vrot.slane %v1211_v53, 1 }
 0x1aa   : > { %v4114_v51 = vpop.eup %4113  ;;  %v1064_v49 = vor.u32 %v1062_v63, %v1061_v26  ;;  %v990_v48 = vmul.f32 %v4112_v45, %v4992_v52  ;;  %v5142_v43 = vsel %vm1011_vm0, %v1061_v26, %v1072_v17  ;;  %v1209_v52 = vor.u32 %v1208_v33, %v1204_v20 }
 0x1ab   : > { %v4116_v30 = vpop.eup %4115  ;;  %v988_v2 = vmul.f32 %v4114_v51, %v4999_v41  ;;  %v1350_v35 = vrot.slane %v5142_v43, 1  ;;  %v5157_v4 = vrot.slane %v1098_v31, 7  ;;  %v1093_v56 = vshll.u32 %v1005_v39, 16 }
 0x1ac   : > { %v1008_v57 = vpack.c.bf16 %v990_v48, %v989_v19  ;;  %v5151_v37 = vsel %vm1011_vm0, %v5082_v59, %v1064_v49  ;;  %v993_v41 = vmul.f32 %v4116_v30, %v5006_v55  ;;  %v1214_v0 = vsel %vm1166_vm4, %v1209_v52, %v1213_v25 }
 0x1ad   : > { %v1348_v12 = vrot.slane %v5151_v37, 1  ;;  %v4118_v42 = vpop.eup %4117  ;;  %v1007_v29 = vpack.c.bf16 %v988_v2, %v987_v36  ;;  %1644 = vmatmul.mubr.bf16.gmra.mxu1 %v5078_v10  ;;  %v1219_v55 = vshll.u32 %v5151_v37, 16  ;;  %v1092_v60 = vrot.slane %v1090_v47, 7 }
 0x1ae   : > { %v1113_v44 = vshrl.u32 %v1008_v57, 16  ;;  %1651 = vmatprep.mubr.bf16.mxu1 %v1214_v0  ;;  %v5169_v34 = vsel %vm5036_vm3, %v1069_v5, 0  ;;  %v1116_v10 = vshll.u32 %v1008_v57, 16  ;;  %v991_v7 = vmul.f32 %v4118_v42, %v5020_v38 }
 0x1af   : > { %v4120_v18 = vpop.eup %4119  ;;  %v1349_v59 = vsel %vm1335_vm2, %v1346_v58, %v1348_v12  ;;  %v1351_v54 = vsel %vm1335_vm2, %v1348_v12, %v1350_v35  ;;  %v5172_v58 = vsel %vm1011_vm0, %v1077_v9, %v1087_v27  ;;  %v1106_v8 = vshrl.u32 %v1007_v29, 16 }
 0x1b0   : > { %v994_v23 = vmul.f32 %v4120_v18, %v5024_v50  ;;  %3745 = vmatmul.mubr.bf16.gmra.mxu0 %v1349_v59  ;;  %v5176_v50 = vsel %vm5036_vm3, 0, %v1080_v15  ;;  %v1115_v61 = vrot.slane %v1113_v44, 7  ;;  %v1355_v14 = vrot.slane %v5172_v58, 1 }
 0x1b1   : > { %3748 = vmatprep.mubr.bf16.mxu0 %v1351_v54  ;;  %v1354_v32 = vrot.slane %v5176_v50, 1  ;;  %v1215_v5 = vshrl.u32 %v5103_v62, 16  ;;  %v1221_v17 = vrot.slane %v1219_v55, 1  ;;  %v1103_v19 = vor.u32 %v1101_v22, %v5157_v4 }
 0x1b2   : > { %v1010_v46 = vpack.c.bf16 %v994_v23, %v993_v41  ;;  %v4122_v3 = vpop.eup %4121  ;;  %v1095_v26 = vor.u32 %v1093_v56, %v1092_v60  ;;  %v1352_v63 = vrot.slane %v5169_v34, 1  ;;  %v1118_v38 = vor.u32 %v1116_v10, %v1115_v61 }
 0x1b3   : > { %v992_v16 = vmul.f32 %v4122_v3, %v5030_v13  ;;  %v1217_v45 = vor.u32 %v1215_v5, %v1213_v25  ;;  %v1108_v9 = vrot.slane %v1106_v8, 7  ;;  %v1109_v28 = vshll.u32 %v1007_v29, 16 }
 0x1b4   : > { %v1129_v24 = vshrl.u32 %v1010_v46, 16  ;;  %v1132_v11 = vshll.u32 %v1010_v46, 16  ;;  %v1353_v39 = vsel %vm1335_vm2, %v1350_v35, %v1352_v63  ;;  %v1356_v20 = vsel %vm1335_vm2, %v1354_v32, %v1355_v14 }
 0x1b5   : > { %v1009_v33 = vpack.c.bf16 %v992_v16, %v991_v7  ;;  %1652 = vmatmul.mubr.bf16.gmra.mxu1 %v5107_v21  ;;  %v1222_v13 = vsel %vm1166_vm4, %v1217_v45, %v1221_v17  ;;  %v5191_v53 = vsel %vm1011_vm0, %v5130_v1, %v1095_v26  ;;  %v5194_v30 = vsel %vm1011_vm0, %v1092_v60, %v1103_v19 }
 0x1b6   : > { %v1131_v40 = vrot.slane %v1129_v24, 7  ;;  %1659 = vmatprep.mubr.bf16.mxu1 %v1222_v13  ;;  %v1223_v31 = vshrl.u32 %v5151_v37, 16  ;;  %v1227_v2 = vshll.u32 %v5142_v43, 16  ;;  %v5199_v27 = vsel %vm1011_vm0, %v1108_v9, %v1118_v38 }
 0x1b7   : > { %v1121_v49 = vshrl.u32 %v1009_v33, 16  ;;  %v1124_v48 = vshll.u32 %v1009_v33, 16  ;;  %v1111_v57 = vor.u32 %v1109_v28, %v1108_v9  ;;  %v1357_v52 = vrot.slane %v5191_v53, 1 }
 0x1b8   : > { %v1134_v51 = vor.u32 %v1132_v11, %v1131_v40  ;;  %3749 = vmatmul.mubr.bf16.gmra.mxu0 %v1353_v39  ;;  %v1165_v21 = vsel %vm5036_vm3, %v1131_v40, 0  ;;  %v1359_v47 = vrot.slane %v5194_v30, 1  ;;  %v1225_v12 = vor.u32 %v1223_v31, %v1221_v17 }
 0x1b9   : > { %3752 = vmatprep.mubr.bf16.mxu0 %v1356_v20  ;;  %v1123_v36 = vrot.slane %v1121_v49, 7  ;;  %v1370_v15 = vrot.slane %v1165_v21, 1  ;;  %v1364_v42 = vrot.slane %v5199_v27, 1  ;;  %v1229_v44 = vrot.slane %v1227_v2, 1 }
 0x1ba   : > { %v1358_v25 = vsel %vm1335_vm2, %v1355_v14, %v1357_v52  ;;  %v5216_v18 = vsel %vm5036_vm3, 0, %v1111_v57  ;;  %v1360_v54 = vsel %vm1335_vm2, %v1357_v52, %v1359_v47  ;;  %v5226_v23 = vsel %vm5036_vm3, %v5157_v4, 0 }
 0x1bb   : > { %v1126_v1 = vor.u32 %v1124_v48, %v1123_v36  ;;  %v5206_v35 = vsel %vm1011_vm0, %v1123_v36, %v1134_v51  ;;  %v1230_v56 = vsel %vm1166_vm4, %v1225_v12, %v1229_v44  ;;  %v1231_v0 = vshrl.u32 %v5142_v43, 16 }
 0x1bc   : > { %v1368_v22 = vrot.slane %v5206_v35, 1  ;;  %v1235_v55 = vshll.u32 %v5169_v34, 16  ;;  %v1283_v10 = vshll.u32 %v5199_v27, 16  ;;  %v1287_v7 = vshrl.u32 %v5199_v27, 16 }
 0x1bd   : > { %v5211_v41 = vsel %vm1011_vm0, %v1115_v61, %v1126_v1  ;;  %1660 = vmatmul.mubr.bf16.gmra.mxu1 %v5103_v62  ;;  %v1363_v62 = vrot.slane %v5216_v18, 1  ;;  %v1361_v46 = vrot.slane %v5226_v23, 1  ;;  %v1299_v8 = vshll.u32 %v5206_v35, 16 }
 0x1be   : > { %v1366_v29 = vrot.slane %v5211_v41, 1  ;;  %v1371_v59 = vsel %vm1335_vm2, %v1368_v22, %v1370_v15  ;;  %1667 = vmatprep.mubr.bf16.mxu1 %v1230_v56  ;;  %v1291_v6 = vshll.u32 %v5211_v41, 16  ;;  %v1295_v4 = vshrl.u32 %v5211_v41, 16  ;;  %v3973_v56 = vld [vmem:[#allocation8 + $0x28] sm:$0xff]  }
 0x1bf   : > { %v1285_v3 = vrot.slane %v1283_v10, 1  ;;  %v1303_v34 = vshrl.u32 %v5206_v35, 16  ;;  %v1233_v32 = vor.u32 %v1231_v0, %v1229_v44  ;;  %v1242_v14 = vshll.u32 %v5176_v50, 16 }
 0x1c0   : > { %3753 = vmatmul.mubr.bf16.gmra.mxu0 %v1358_v25  ;;  %v1367_v60 = vsel %vm1335_vm2, %v1364_v42, %v1366_v29  ;;  %v1369_v61 = vsel %vm1335_vm2, %v1366_v29, %v1368_v22  ;;  %v1293_v5 = vrot.slane %v1291_v6, 1  ;;  %v1307_v24 = vshll.u32 %v1165_v21, 16 }
 0x1c1   : > { %3756 = vmatprep.mubr.bf16.mxu0 %v1360_v54  ;;  %v1289_v11 = vor.u32 %v1287_v7, %v1285_v3  ;;  %v1301_v16 = vrot.slane %v1299_v8, 1  ;;  %v1237_v17 = vrot.slane %v1235_v55, 1  ;;  %v1365_v19 = vsel %vm1335_vm2, %v1363_v62, %v1364_v42  ;;  %v3971_v54 = vld [vmem:[#allocation8 + $0x38] sm:$0xff]  }
 0x1c2   : > { %v1297_v26 = vor.u32 %v1295_v4, %v1293_v5  ;;  %v1309_v63 = vrot.slane %v1307_v24, 1  ;;  %v1362_v38 = vsel %vm1335_vm2, %v1359_v47, %v1361_v46  ;;  %v1240_v9 = vshrl.u32 %v5176_v50, 16  ;;  %3768 = vmatprep.subr.bf16.mxu0 %v3971_v54 }
 0x1c3   : > { %v1294_v40 = vsel %vm1166_vm4, %v1289_v11, %v1293_v5  ;;  %v1305_v33 = vor.u32 %v1303_v34, %v1301_v16  ;;  %v1238_v45 = vsel %vm1166_vm4, %v1233_v32, %v1237_v17  ;;  %v1244_v28 = vrot.slane %v1242_v14, 1  ;;  %3769 = vmatpush3.bf16.msra.mxu0 %v3971_v54 }
 0x1c4   : > { %v1302_v39 = vsel %vm1166_vm4, %v1297_v26, %v1301_v16  ;;  %v1247_v51 = vshll.u32 %v5172_v58, 16  ;;  %v1251_v13 = vshrl.u32 %v5172_v58, 16  ;;  %v1255_v31 = vshll.u32 %v5191_v53, 16 }
 0x1c5   : > { %1668 = vmatmul.mubr.bf16.gmra.mxu1 %v5151_v37  ;;  %v1310_v20 = vsel %vm1166_vm4, %v1305_v33, %v1309_v63  ;;  %v1245_v49 = vor.u32 %v1244_v28, %v1240_v9  ;;  %v1259_v57 = vshrl.u32 %v5191_v53, 16  ;;  %v1263_v52 = vshll.u32 %v5194_v30, 16 }
 0x1c6   : > { %1675 = vmatprep.mubr.bf16.mxu1 %v1238_v45  ;;  %v1249_v48 = vrot.slane %v1247_v51, 1  ;;  %v1257_v2 = vrot.slane %v1255_v31, 1  ;;  %v1267_v47 = vshrl.u32 %v5194_v30, 16  ;;  %v1271_v12 = vshll.u32 %v5226_v23, 16  ;;  %v3977_v23 = vld [vmem:[#allocation8 + $0x8] sm:$0xff]  }
 0x1c7   : > { %v1265_v15 = vrot.slane %v1263_v52, 1  ;;  %v1278_v22 = vshll.u32 %v5216_v18, 16  ;;  %v1276_v25 = vshrl.u32 %v5216_v18, 16 }
 0x1c8   : > { %3757 = vmatmul.mubr.bf16.gmra.mxu0 %v1362_v38  ;;  %v1250_v37 = vsel %vm1166_vm4, %v1245_v49, %v1249_v48  ;;  %v1253_v36 = vor.u32 %v1251_v13, %v1249_v48 }
 0x1c9   : > { %3760 = vmatprep.mubr.bf16.mxu0 %v1365_v19  ;;  %v1269_v42 = vor.u32 %v1267_v47, %v1265_v15  ;;  %v1280_v29 = vrot.slane %v1278_v22, 1 }
 0x1ca   : > { %v1258_v21 = vsel %vm1166_vm4, %v1253_v36, %v1257_v2 }
 0x1cd   : > { %1676 = vmatmul.mubr.bf16.gmra.mxu1 %v5142_v43  ;;  %v1261_v43 = vor.u32 %v1259_v57, %v1257_v2 }
 0x1ce   : > { %1683 = vmatprep.mubr.bf16.mxu1 %v1250_v37 }
 0x1cf   : > { %v1266_v1 = vsel %vm1166_vm4, %v1261_v43, %v1265_v15 }
 0x1d0   : > { %3761 = vmatmul.mubr.bf16.gmra.mxu0 %v1367_v60 }
 0x1d1   : > { %3764 = vmatprep.mubr.bf16.mxu0 %v1369_v61 }
 0x1d5   : > { %1684 = vmatmul.mubr.bf16.gmra.mxu1 %v5176_v50  ;;  %v1273_v50 = vrot.slane %v1271_v12, 1 }
 0x1d6   : > { %1691 = vmatprep.mubr.bf16.mxu1 %v1258_v21 }
 0x1d7   : > { %v1274_v44 = vsel %vm1166_vm4, %v1269_v42, %v1273_v50 }
 0x1d8   : > { %3765 = vmatmul.mubr.bf16.gmra.mxu0 %v1371_v59 }
 0x1dd   : > { %1692 = vmatmul.mubr.bf16.gmra.mxu1 %v5172_v58  ;;  %v1281_v58 = vor.u32 %v1280_v29, %v1276_v25 }
 0x1de   : > { %1699 = vmatprep.mubr.bf16.mxu1 %v1266_v1 }
 0x1df   : > { %v1286_v59 = vsel %vm1166_vm4, %v1281_v58, %v1285_v3 }
 0x1e5   : > { %1700 = vmatmul.mubr.bf16.gmra.mxu1 %v5191_v53  ;;  %v3972_v53 = vld [vmem:[#allocation8 + $0x30] sm:$0xff]  }
 0x1e6   : > { %1707 = vmatprep.mubr.bf16.mxu1 %v1274_v44  ;;  %3770 = vmatprep.subr.bf16.mxu0 %v3972_v53 }
 0x1e7   : > { %3771 = vmatpush3.bf16.msra.mxu0 %v3972_v53 }
 0x1e8   : > { %3772 = vmatprep.subr.bf16.mxu0 %v3973_v56 }
 0x1eb   : > { %3773 = vmatpush3.bf16.msra.mxu0 %v3973_v56 }
 0x1ed   : > { %1708 = vmatmul.mubr.bf16.gmra.mxu1 %v5194_v30  ;;  %v3974_v30 = vld [vmem:[#allocation8 + $0x20] sm:$0xff]  }
 0x1ee   : > { %1715 = vmatprep.mubr.bf16.mxu1 %v1286_v59  ;;  %3774 = vmatprep.subr.bf16.mxu0 %v3974_v30 }
 0x1ef   : > { %3775 = vmatpush3.bf16.msra.mxu0 %v3974_v30 }
 0x1f5   : > { %1716 = vmatmul.mubr.bf16.gmra.mxu1 %v5216_v18  ;;  %v3975_v18 = vld [vmem:[#allocation8 + $0x18] sm:$0xff]  }
 0x1f6   : > { %1723 = vmatprep.mubr.bf16.mxu1 %v1294_v40  ;;  %3776 = vmatprep.subr.bf16.mxu0 %v3975_v18 }
 0x1f7   : > { %3777 = vmatpush3.bf16.msra.mxu0 %v3975_v18 }
 0x1fd   : > { %1724 = vmatmul.mubr.bf16.gmra.mxu1 %v5199_v27  ;;  %v3976_v27 = vld [vmem:[#allocation8 + $0x10] sm:$0xff]  }
 0x1fe   : > { %1731 = vmatprep.mubr.bf16.mxu1 %v1302_v39  ;;  %3778 = vmatprep.subr.bf16.mxu0 %v3976_v27 }
 0x1ff   : > { %3779 = vmatpush3.bf16.msra.mxu0 %v3976_v27 }
 0x200   : > { %3780 = vmatprep.subr.bf16.mxu0 %v3977_v23 }
 0x203   : > { %3781 = vmatpush3.bf16.msra.mxu0 %v3977_v23 }
 0x205   : > { %1732 = vmatmul.mubr.bf16.gmra.mxu1 %v5211_v41  ;;  %v3978_v41 = vld [vmem:[#allocation8] sm:$0xff]  }
 0x206   : > { %1739 = vmatprep.mubr.bf16.mxu1 %v1310_v20  ;;  %3782 = vmatprep.subr.bf16.mxu0 %v3978_v41 }
 0x207   : > { %3783 = vmatpush3.bf16.msra.mxu0 %v3978_v41 }
 0x20d   : > { %1740 = vmatmul.mubr.bf16.gmra.mxu1 %v5206_v35  ;;  %v5275_v35 = vld [vmem:[%s5835_s4] ss:$0 sm:$0xff] }
 0x252   : > { %v3738_v0 = vpop.f32.mrf.mxu0 }
 0x254   : > { %v1782_v60 = vpop.f32.mrf.mxu0 }
 0x255   : > { %v3528_v55 = vpop.f32.mrf.mxu1 }
 0x256   : > { %v3739_v7 = vpop.f32.mrf.mxu0 }
 0x257   : > { %v3529_v61 = vpop.f32.mrf.mxu1 }
 0x258   : > { %v3530_v10 = vadd.f32 %v3529_v61, %v3528_v55  ;;  %v1785_v34 = vpop.f32.mrf.mxu0 }
 0x259   : > { %v3531_v62 = vpop.f32.mrf.mxu1 }
 0x25a   : > { %v1622_v6 = vadd.f32 %v3530_v10, %v5275_v35 }
 0x25b   : > { %v3532_v4 = vpop.f32.mrf.mxu1 }
 0x25c   : > { %v5278_v46 = vadd.f32 %v1782_v60, %v1622_v6  ;;  %v3533_v3 = vadd.f32 %v3532_v4, %v3531_v62 }
 0x25d   : > { %v3534_v8 = vpop.f32.mrf.mxu1  ;;  %v3742_v26 = vpop.f32.mrf.mxu0 }
 0x25e   : > { %v3238_v32 = vmul.f32 -1.442695, %v5278_v46  ;;  %v1625_v14 = vadd.f32 %v3533_v3, %v5275_v35 }
 0x25f   : > { %v3535_v5 = vpop.f32.mrf.mxu1  ;;  %v1798_v28 = vpop.f32.mrf.mxu0 }
 0x260   : > { %4123 = vpow2.f32 %v3238_v32  ;;  %v5282_v24 = vadd.f32 %v1785_v34, %v1625_v14  ;;  %v3536_v11 = vadd.f32 %v3535_v5, %v3534_v8 }
 0x261   : > { %v3537_v16 = vpop.f32.mrf.mxu1  ;;  %v3743_v13 = vpop.f32.mrf.mxu0 }
 0x262   : > { %v3239_v17 = vmul.f32 -1.442695, %v5282_v24  ;;  %v1630_v19 = vadd.f32 %v3536_v11, %v5275_v35 }
 0x263   : > { %v3538_v63 = vpop.f32.mrf.mxu1  ;;  %v1801_v1 = vpop.f32.mrf.mxu0 }
 0x264   : > { %4125 = vpow2.f32 %v3239_v17  ;;  %v5286_v38 = vadd.f32 %v3738_v0, %v1630_v19  ;;  %v3539_v40 = vadd.f32 %v3538_v63, %v3537_v16 }
 0x265   : > { %v3540_v33 = vpop.f32.mrf.mxu1 }
 0x266   : > { %v3240_v45 = vmul.f32 -1.442695, %v5286_v38  ;;  %v1633_v9 = vadd.f32 %v3539_v40, %v5275_v35 }
 0x267   : > { %v3541_v39 = vpop.f32.mrf.mxu1 }
 0x268   : > { %4127 = vpow2.f32 %v3240_v45  ;;  %v5290_v20 = vadd.f32 %v3739_v7, %v1633_v9  ;;  %v3542_v51 = vadd.f32 %v3541_v39, %v3540_v33 }
 0x269   : > { %v3543_v49 = vpop.f32.mrf.mxu1 }
 0x26a   : > { %v3241_v48 = vmul.f32 -1.442695, %v5290_v20  ;;  %v1638_v37 = vadd.f32 %v3542_v51, %v5275_v35 }
 0x26b   : > { %v3544_v31 = vpop.f32.mrf.mxu1 }
 0x26c   : > { %4129 = vpow2.f32 %v3241_v48  ;;  %v5294_v36 = vadd.f32 %v1798_v28, %v1638_v37  ;;  %v3545_v2 = vadd.f32 %v3544_v31, %v3543_v49 }
 0x26d   : > { %v4124_v21 = vpop.eup %4123  ;;  %v3546_v57 = vpop.f32.mrf.mxu1 }
 0x26e   : > { %v2005_v52 = vadd.f32 1.0, %v4124_v21  ;;  %v3242_v43 = vmul.f32 -1.442695, %v5294_v36  ;;  %v1641_v15 = vadd.f32 %v3545_v2, %v5275_v35 }
 0x26f   : > { %v3547_v47 = vpop.f32.mrf.mxu1 }
 0x270   : > { %v5298_v12 = vadd.f32 %v1801_v1, %v1641_v15  ;;  %v3548_v42 = vadd.f32 %v3547_v47, %v3546_v57  ;;  %4131 = vpow2.f32 %v3242_v43  ;;  %v3746_v58 = vpop.f32.mrf.mxu0 }
 0x271   : > { %v4126_v50 = vpop.eup %4125  ;;  %v3549_v22 = vpop.f32.mrf.mxu1  ;;  %4133 = vrcp.f32 %v2005_v52 }
 0x272   : > { %v2006_v44 = vadd.f32 1.0, %v4126_v50  ;;  %v3243_v25 = vmul.f32 -1.442695, %v5298_v12  ;;  %v1646_v29 = vadd.f32 %v3548_v42, %v5275_v35  ;;  %v1814_v41 = vpop.f32.mrf.mxu0 }
 0x273   : > { %v3550_v59 = vpop.f32.mrf.mxu1 }
 0x274   : > { %4135 = vrcp.f32 %v2006_v44  ;;  %v5302_v54 = vadd.f32 %v3742_v26, %v1646_v29  ;;  %v3551_v53 = vadd.f32 %v3550_v59, %v3549_v22  ;;  %v3747_v4 = vpop.f32.mrf.mxu0 }
 0x275   : > { %v4128_v56 = vpop.eup %4127  ;;  %4137 = vpow2.f32 %v3243_v25  ;;  %v3552_v30 = vpop.f32.mrf.mxu1 }
 0x276   : > { %v2007_v18 = vadd.f32 1.0, %v4128_v56  ;;  %v3244_v27 = vmul.f32 -1.442695, %v5302_v54  ;;  %v1649_v23 = vadd.f32 %v3551_v53, %v5275_v35  ;;  %v1817_v19 = vpop.f32.mrf.mxu0 }
 0x277   : > { %v3553_v0 = vpop.f32.mrf.mxu1 }
 0x278   : > { %v5306_v55 = vadd.f32 %v3743_v13, %v1649_v23  ;;  %v3554_v60 = vadd.f32 %v3553_v0, %v3552_v30  ;;  %4139 = vpow2.f32 %v3244_v27  ;;  %v3750_v37 = vpop.f32.mrf.mxu0 }
 0x279   : > { %v4130_v61 = vpop.eup %4129  ;;  %v3555_v10 = vpop.f32.mrf.mxu1  ;;  %4141 = vrcp.f32 %v2007_v18 }
 0x27a   : > { %v2008_v62 = vadd.f32 1.0, %v4130_v61  ;;  %v3245_v7 = vmul.f32 -1.442695, %v5306_v55  ;;  %v1654_v6 = vadd.f32 %v3554_v60, %v5275_v35  ;;  %v1830_v1 = vpop.f32.mrf.mxu0 }
 0x27b   : > { %v3556_v3 = vpop.f32.mrf.mxu1 }
 0x27c   : > { %4143 = vrcp.f32 %v2008_v62  ;;  %v5310_v8 = vadd.f32 %v1814_v41, %v1654_v6  ;;  %v3557_v34 = vadd.f32 %v3556_v3, %v3555_v10  ;;  %v3751_v30 = vpop.f32.mrf.mxu0 }
 0x27d   : > { %4145 = vpow2.f32 %v3245_v7  ;;  %v3558_v32 = vpop.f32.mrf.mxu1  ;;  %v4132_v14 = vpop.eup %4131 }
 0x27e   : > { %v3246_v5 = vmul.f32 -1.442695, %v5310_v8  ;;  %v1657_v11 = vadd.f32 %v3557_v34, %v5275_v35  ;;  %v4134_v16 = vpop.eup %4133  ;;  %v2009_v17 = vadd.f32 1.0, %v4132_v14  ;;  %v1833_v10 = vpop.f32.mrf.mxu0 }
 0x27f   : > { %v3559_v26 = vpop.f32.mrf.mxu1  ;;  %v2101_v28 = vmul.f32 %v4134_v16, %v5278_v46 }
 0x280   : > { %4147 = vpow2.f32 %v3246_v5  ;;  %v5314_v63 = vadd.f32 %v1817_v19, %v1657_v11  ;;  %v3560_v40 = vadd.f32 %v3559_v26, %v3558_v32  ;;  %v3754_v16 = vpop.f32.mrf.mxu0 }
 0x281   : > { %v4136_v33 = vpop.eup %4135  ;;  %v3561_v45 = vpop.f32.mrf.mxu1  ;;  %4149 = vrcp.f32 %v2009_v17 }
 0x282   : > { %v4138_v9 = vpop.eup %4137  ;;  %v2102_v39 = vmul.f32 %v4136_v33, %v5282_v24  ;;  %v3247_v51 = vmul.f32 -1.442695, %v5314_v63  ;;  %v1662_v49 = vadd.f32 %v3560_v40, %v5275_v35 }
 0x283   : > { %v2010_v48 = vadd.f32 1.0, %v4138_v9  ;;  %v3562_v13 = vpop.f32.mrf.mxu1 }
 0x284   : > { %4151 = vpow2.f32 %v3247_v51  ;;  %v5320_v31 = vadd.f32 %v3746_v58, %v1662_v49  ;;  %v3563_v2 = vadd.f32 %v3562_v13, %v3561_v45  ;;  %v2133_v21 = vpack.c.bf16 %v2102_v39, %v2101_v28 }
 0x285   : > { %4153 = vrcp.f32 %v2010_v48  ;;  %v3564_v57 = vpop.f32.mrf.mxu1  ;;  %v4140_v52 = vpop.eup %4139 }
 0x286   : > { %v3248_v46 = vmul.f32 -1.442695, %v5320_v31  ;;  %v1665_v24 = vadd.f32 %v3563_v2, %v5275_v35  ;;  %3784 = vmatprep.mubr.bf16.mxu0 %v2133_v21  ;;  %v4142_v43 = vpop.eup %4141  ;;  %v2011_v15 = vadd.f32 1.0, %v4140_v52  ;;  %v1846_v48 = vpop.f32.mrf.mxu0 }
 0x287   : > { %v3565_v47 = vpop.f32.mrf.mxu1  ;;  %v2103_v29 = vmul.f32 %v4142_v43, %v5286_v38 }
 0x288   : > { %4155 = vpow2.f32 %v3248_v46  ;;  %v5324_v42 = vadd.f32 %v3747_v4, %v1665_v24  ;;  %v3566_v50 = vadd.f32 %v3565_v47, %v3564_v57  ;;  %v3755_v43 = vpop.f32.mrf.mxu0 }
 0x289   : > { %v4144_v22 = vpop.eup %4143  ;;  %v3567_v44 = vpop.f32.mrf.mxu1  ;;  %4157 = vrcp.f32 %v2011_v15 }
 0x28a   : > { %v4146_v25 = vpop.eup %4145  ;;  %v2104_v58 = vmul.f32 %v4144_v22, %v5290_v20  ;;  %v3249_v59 = vmul.f32 -1.442695, %v5324_v42  ;;  %v1670_v53 = vadd.f32 %v3566_v50, %v5275_v35 }
 0x28b   : > { %v2012_v56 = vadd.f32 1.0, %v4146_v25  ;;  %v3568_v18 = vpop.f32.mrf.mxu1 }
 0x28c   : > { %v2134_v27 = vpack.c.bf16 %v2104_v58, %v2103_v29  ;;  %4159 = vpow2.f32 %v3249_v59  ;;  %v5330_v23 = vadd.f32 %v1830_v1, %v1670_v53  ;;  %v3569_v41 = vadd.f32 %v3568_v18, %v3567_v44 }
 0x28d   : > { %v4148_v0 = vpop.eup %4147  ;;  %4161 = vrcp.f32 %v2012_v56  ;;  %v3570_v60 = vpop.f32.mrf.mxu1 }
 0x28e   : > { %v2013_v61 = vadd.f32 1.0, %v4148_v0  ;;  %v3250_v38 = vmul.f32 -1.442695, %v5330_v23  ;;  %v1673_v20 = vadd.f32 %v3569_v41, %v5275_v35  ;;  %3785 = vmatmul.mubr.bf16.vlgmr.msra.gmra.mxu0 %v2134_v27  ;;  %v4150_v7 = vpop.eup %4149  ;;  %v1849_v56 = vpop.f32.mrf.mxu0 }
 0x28f   : > { %v3571_v62 = vpop.f32.mrf.mxu1  ;;  %v2105_v19 = vmul.f32 %v4150_v7, %v5294_v36 }
 0x290   : > { %v5334_v6 = vadd.f32 %v1833_v10, %v1673_v20  ;;  %v3572_v4 = vadd.f32 %v3571_v62, %v3570_v60  ;;  %4163 = vpow2.f32 %v3250_v38  ;;  %v3758_v10 = vpop.f32.mrf.mxu0 }
 0x291   : > { %v4152_v3 = vpop.eup %4151  ;;  %v3573_v34 = vpop.f32.mrf.mxu1  ;;  %4165 = vrcp.f32 %v2013_v61 }
 0x292   : > { %v4154_v32 = vpop.eup %4153  ;;  %v2014_v14 = vadd.f32 1.0, %v4152_v3  ;;  %v3251_v5 = vmul.f32 -1.442695, %v5334_v6  ;;  %v1678_v11 = vadd.f32 %v3572_v4, %v5275_v35 }
 0x293   : > { %v3574_v17 = vpop.f32.mrf.mxu1  ;;  %v2106_v26 = vmul.f32 %v4154_v32, %v5298_v12 }
 0x294   : > { %4167 = vrcp.f32 %v2014_v14  ;;  %v5340_v40 = vadd.f32 %v3750_v37, %v1678_v11  ;;  %v3575_v33 = vadd.f32 %v3574_v17, %v3573_v34  ;;  %v1862_v17 = vpop.f32.mrf.mxu0 }
 0x295   : > { %v4156_v45 = vpop.eup %4155  ;;  %4169 = vpow2.f32 %v3251_v5  ;;  %v3576_v9 = vpop.f32.mrf.mxu1  ;;  %v2135_v28 = vpack.c.bf16 %v2106_v26, %v2105_v19 }
 0x296   : > { %v2015_v39 = vadd.f32 1.0, %v4156_v45  ;;  %v3252_v51 = vmul.f32 -1.442695, %v5340_v40  ;;  %v1681_v49 = vadd.f32 %v3575_v33, %v5275_v35  ;;  %v4158_v2 = vpop.eup %4157 }
 0x297   : > { %3788 = vmatprep.mubr.bf16.mxu0 %v2135_v28  ;;  %v3577_v13 = vpop.f32.mrf.mxu1  ;;  %v2107_v1 = vmul.f32 %v4158_v2, %v5302_v54 }
 0x298   : > { %v5344_v36 = vadd.f32 %v3751_v30, %v1681_v49  ;;  %v3578_v12 = vadd.f32 %v3577_v13, %v3576_v9  ;;  %4171 = vpow2.f32 %v3252_v51 }
 0x299   : > { %v4160_v21 = vpop.eup %4159  ;;  %v3579_v37 = vpop.f32.mrf.mxu1  ;;  %4173 = vrcp.f32 %v2015_v39 }
 0x29a   : > { %v4162_v57 = vpop.eup %4161  ;;  %v2016_v52 = vadd.f32 1.0, %v4160_v21  ;;  %v3253_v46 = vmul.f32 -1.442695, %v5344_v36  ;;  %v1686_v24 = vadd.f32 %v3578_v12, %v5275_v35 }
 0x29b   : > { %v3580_v15 = vpop.f32.mrf.mxu1  ;;  %v2108_v47 = vmul.f32 %v4162_v57, %v5306_v55 }
 0x29c   : > { %4175 = vrcp.f32 %v2016_v52  ;;  %v5350_v50 = vadd.f32 %v1846_v48, %v1686_v24  ;;  %v3581_v22 = vadd.f32 %v3580_v15, %v3579_v37  ;;  %v3759_v48 = vpop.f32.mrf.mxu0 }
 0x29d   : > { %4177 = vpow2.f32 %v3253_v46  ;;  %v3582_v44 = vpop.f32.mrf.mxu1  ;;  %v2136_v25 = vpack.c.bf16 %v2108_v47, %v2107_v1  ;;  %v4164_v29 = vpop.eup %4163 }
 0x29e   : > { %v3254_v58 = vmul.f32 -1.442695, %v5350_v50  ;;  %v1689_v59 = vadd.f32 %v3581_v22, %v5275_v35  ;;  %v4166_v53 = vpop.eup %4165  ;;  %v2017_v30 = vadd.f32 1.0, %v4164_v29 }
 0x29f   : > { %3789 = vmatmul.mubr.bf16.gmra.mxu0 %v2136_v25  ;;  %v3583_v18 = vpop.f32.mrf.mxu1  ;;  %v2109_v38 = vmul.f32 %v4166_v53, %v5310_v8 }
 0x2a0   : > { %4179 = vpow2.f32 %v3254_v58  ;;  %v5354_v54 = vadd.f32 %v1849_v56, %v1689_v59  ;;  %v3584_v55 = vadd.f32 %v3583_v18, %v3582_v44 }
 0x2a1   : > { %v4168_v27 = vpop.eup %4167  ;;  %v3585_v41 = vpop.f32.mrf.mxu1  ;;  %4181 = vrcp.f32 %v2017_v30 }
 0x2a2   : > { %v4170_v0 = vpop.eup %4169  ;;  %v3255_v60 = vmul.f32 -1.442695, %v5354_v54  ;;  %v1694_v61 = vadd.f32 %v3584_v55, %v5275_v35  ;;  %v2110_v20 = vmul.f32 %v4168_v27, %v5314_v63 }
 0x2a3   : > { %v2018_v62 = vadd.f32 1.0, %v4170_v0  ;;  %v3586_v7 = vpop.f32.mrf.mxu1 }
 0x2a4   : > { %4183 = vpow2.f32 %v3255_v60  ;;  %v5360_v4 = vadd.f32 %v3754_v16, %v1694_v61  ;;  %v3587_v3 = vadd.f32 %v3586_v7, %v3585_v41  ;;  %v2137_v34 = vpack.c.bf16 %v2110_v20, %v2109_v38 }
 0x2a5   : > { %4185 = vrcp.f32 %v2018_v62  ;;  %v3588_v32 = vpop.f32.mrf.mxu1  ;;  %v4172_v14 = vpop.eup %4171 }
 0x2a6   : > { %v3256_v5 = vmul.f32 -1.442695, %v5360_v4  ;;  %v1697_v11 = vadd.f32 %v3587_v3, %v5275_v35  ;;  %3792 = vmatprep.mubr.bf16.mxu0 %v2137_v34  ;;  %v4174_v8 = vpop.eup %4173  ;;  %v2019_v63 = vadd.f32 1.0, %v4172_v14 }
 0x2a7   : > { %v3589_v19 = vpop.f32.mrf.mxu1  ;;  %v2111_v51 = vmul.f32 %v4174_v8, %v5320_v31  ;;  %v1865_v31 = vpop.f32.mrf.mxu0 }
 0x2a8   : > { %4187 = vpow2.f32 %v3256_v5  ;;  %v5364_v26 = vadd.f32 %v3755_v43, %v1697_v11  ;;  %v3590_v33 = vadd.f32 %v3589_v19, %v3588_v32 }
 0x2a9   : > { %v4176_v16 = vpop.eup %4175  ;;  %v3591_v45 = vpop.f32.mrf.mxu1  ;;  %4189 = vrcp.f32 %v2019_v63 }
 0x2aa   : > { %v4178_v9 = vpop.eup %4177  ;;  %v3257_v28 = vmul.f32 -1.442695, %v5364_v26  ;;  %v1702_v39 = vadd.f32 %v3590_v33, %v5275_v35  ;;  %v2112_v49 = vmul.f32 %v4176_v16, %v5324_v42  ;;  %v3762_v53 = vpop.f32.mrf.mxu0 }
 0x2ab   : > { %v2020_v13 = vadd.f32 1.0, %v4178_v9  ;;  %v3592_v2 = vpop.f32.mrf.mxu1 }
 0x2ac   : > { %4191 = vpow2.f32 %v3257_v28  ;;  %v5370_v12 = vadd.f32 %v1862_v17, %v1702_v39  ;;  %v3593_v21 = vadd.f32 %v3592_v2, %v3591_v45  ;;  %v2138_v37 = vpack.c.bf16 %v2112_v49, %v2111_v51  ;;  %v1878_v62 = vpop.f32.mrf.mxu0 }
 0x2ad   : > { %v4180_v57 = vpop.eup %4179  ;;  %4193 = vrcp.f32 %v2020_v13  ;;  %v3594_v52 = vpop.f32.mrf.mxu1 }
 0x2ae   : > { %v2021_v46 = vadd.f32 1.0, %v4180_v57  ;;  %v3258_v24 = vmul.f32 -1.442695, %v5370_v12  ;;  %v1705_v43 = vadd.f32 %v3593_v21, %v5275_v35  ;;  %3793 = vmatmul.mubr.bf16.gmra.mxu0 %v2138_v37  ;;  %v4182_v15 = vpop.eup %4181  ;;  %v3763_v8 = vpop.f32.mrf.mxu0 }
 0x2af   : > { %v3595_v42 = vpop.f32.mrf.mxu1  ;;  %v2113_v30 = vmul.f32 %v4182_v15, %v5330_v23 }
 0x2b0   : > { %v5374_v1 = vadd.f32 %v1865_v31, %v1705_v43  ;;  %v3596_v47 = vadd.f32 %v3595_v42, %v3594_v52  ;;  %4195 = vpow2.f32 %v3258_v24 }
 0x2b1   : > { %v4184_v22 = vpop.eup %4183  ;;  %v3597_v44 = vpop.f32.mrf.mxu1  ;;  %4197 = vrcp.f32 %v2021_v46 }
 0x2b2   : > { %v4186_v25 = vpop.eup %4185  ;;  %v2022_v29 = vadd.f32 1.0, %v4184_v22  ;;  %v3259_v58 = vmul.f32 -1.442695, %v5374_v1  ;;  %v1710_v59 = vadd.f32 %v3596_v47, %v5275_v35 }
 0x2b3   : > { %v3598_v56 = vpop.f32.mrf.mxu1  ;;  %v2114_v18 = vmul.f32 %v4186_v25, %v5334_v6 }
 0x2b4   : > { %4199 = vrcp.f32 %v2022_v29  ;;  %v5380_v55 = vadd.f32 %v3758_v10, %v1710_v59  ;;  %v3599_v27 = vadd.f32 %v3598_v56, %v3597_v44 }
 0x2b5   : > { %v4188_v41 = vpop.eup %4187  ;;  %4201 = vpow2.f32 %v3259_v58  ;;  %v3600_v0 = vpop.f32.mrf.mxu1  ;;  %v2139_v60 = vpack.c.bf16 %v2114_v18, %v2113_v30 }
 0x2b6   : > { %v2023_v61 = vadd.f32 1.0, %v4188_v41  ;;  %v3260_v38 = vmul.f32 -1.442695, %v5380_v55  ;;  %v1713_v20 = vadd.f32 %v3599_v27, %v5275_v35  ;;  %v4190_v3 = vpop.eup %4189 }
 0x2b7   : > { %3796 = vmatprep.mubr.bf16.mxu0 %v2139_v60  ;;  %v3601_v7 = vpop.f32.mrf.mxu1  ;;  %v2115_v63 = vmul.f32 %v4190_v3, %v5340_v40 }
 0x2b8   : > { %v5384_v23 = vadd.f32 %v3759_v48, %v1713_v20  ;;  %v3602_v6 = vadd.f32 %v3601_v7, %v3600_v0  ;;  %4203 = vpow2.f32 %v3260_v38  ;;  %v1881_v48 = vpop.f32.mrf.mxu0 }
 0x2b9   : > { %v4192_v34 = vpop.eup %4191  ;;  %v3603_v10 = vpop.f32.mrf.mxu1  ;;  %4205 = vrcp.f32 %v2023_v61 }
 0x2ba   : > { %v4194_v32 = vpop.eup %4193  ;;  %v2024_v14 = vadd.f32 1.0, %v4192_v34  ;;  %v3261_v5 = vmul.f32 -1.442695, %v5384_v23  ;;  %v1718_v11 = vadd.f32 %v3602_v6, %v5275_v35  ;;  %v3766_v31 = vpop.f32.mrf.mxu0 }
 0x2bb   : > { %v3604_v17 = vpop.f32.mrf.mxu1  ;;  %v2116_v19 = vmul.f32 %v4194_v32, %v5344_v36 }
 0x2bc   : > { %4207 = vrcp.f32 %v2024_v14  ;;  %v5390_v33 = vadd.f32 %v1878_v62, %v1718_v11  ;;  %v3605_v16 = vadd.f32 %v3604_v17, %v3603_v10  ;;  %v1894_v56 = vpop.f32.mrf.mxu0 }
 0x2bd   : > { %4209 = vpow2.f32 %v3261_v5  ;;  %v3606_v45 = vpop.f32.mrf.mxu1  ;;  %v2140_v9 = vpack.c.bf16 %v2116_v19, %v2115_v63  ;;  %v4196_v28 = vpop.eup %4195 }
 0x2be   : > { %v3262_v39 = vmul.f32 -1.442695, %v5390_v33  ;;  %v1721_v51 = vadd.f32 %v3605_v16, %v5275_v35  ;;  %v4198_v49 = vpop.eup %4197  ;;  %v2025_v13 = vadd.f32 1.0, %v4196_v28  ;;  %v3767_v62 = vpop.f32.mrf.mxu0 }
 0x2bf   : > { %3797 = vmatmul.mubr.bf16.gmra.mxu0 %v2140_v9  ;;  %v3607_v2 = vpop.f32.mrf.mxu1  ;;  %v2117_v24 = vmul.f32 %v4198_v49, %v5350_v50 }
 0x2c0   : > { %4211 = vpow2.f32 %v3262_v39  ;;  %v5394_v40 = vadd.f32 %v1881_v48, %v1721_v51  ;;  %v3608_v36 = vadd.f32 %v3607_v2, %v3606_v45 }
 0x2c1   : > { %v4200_v21 = vpop.eup %4199  ;;  %v3609_v37 = vpop.f32.mrf.mxu1  ;;  %4213 = vrcp.f32 %v2025_v13 }
 0x2c2   : > { %v4202_v57 = vpop.eup %4201  ;;  %v3263_v52 = vmul.f32 -1.442695, %v5394_v40  ;;  %v1726_v46 = vadd.f32 %v3608_v36, %v5275_v35  ;;  %v2118_v43 = vmul.f32 %v4200_v21, %v5354_v54 }
 0x2c3   : > { %v2026_v42 = vadd.f32 1.0, %v4202_v57  ;;  %v3610_v15 = vpop.f32.mrf.mxu1 }
 0x2c4   : > { %4215 = vpow2.f32 %v3263_v52  ;;  %v5400_v47 = vadd.f32 %v3762_v53, %v1726_v46  ;;  %v3611_v22 = vadd.f32 %v3610_v15, %v3609_v37  ;;  %v2141_v44 = vpack.c.bf16 %v2118_v43, %v2117_v24 }
 0x2c5   : > { %4217 = vrcp.f32 %v2026_v42  ;;  %v3612_v25 = vpop.f32.mrf.mxu1  ;;  %v4204_v29 = vpop.eup %4203 }
 0x2c6   : > { %v3264_v58 = vmul.f32 -1.442695, %v5400_v47  ;;  %v1729_v59 = vadd.f32 %v3611_v22, %v5275_v35  ;;  %3800 = vmatprep.mubr.bf16.mxu0 %v2141_v44  ;;  %v4206_v50 = vpop.eup %4205  ;;  %v2027_v54 = vadd.f32 1.0, %v4204_v29 }
 0x2c7   : > { %v3613_v30 = vpop.f32.mrf.mxu1  ;;  %v2119_v38 = vmul.f32 %v4206_v50, %v5360_v4  ;;  %v1897_v4 = vpop.f32.mrf.mxu0 }
 0x2c8   : > { %4219 = vpow2.f32 %v3264_v58  ;;  %v5404_v18 = vadd.f32 %v3763_v8, %v1729_v59  ;;  %v3614_v27 = vadd.f32 %v3613_v30, %v3612_v25 }
 0x2c9   : > { %v4208_v53 = vpop.eup %4207  ;;  %v3615_v41 = vpop.f32.mrf.mxu1  ;;  %4221 = vrcp.f32 %v2027_v54 }
 0x2ca   : > { %v4210_v0 = vpop.eup %4209  ;;  %v3265_v60 = vmul.f32 -1.442695, %v5404_v18  ;;  %v1734_v61 = vadd.f32 %v3614_v27, %v5275_v35  ;;  %v2120_v20 = vmul.f32 %v4208_v53, %v5364_v26 }
 0x2cb   : > { %v2028_v7 = vadd.f32 1.0, %v4210_v0  ;;  %v3616_v3 = vpop.f32.mrf.mxu1 }
 0x2cc   : > { %4223 = vpow2.f32 %v3265_v60  ;;  %v5410_v6 = vadd.f32 %v1894_v56, %v1734_v61  ;;  %v3617_v34 = vadd.f32 %v3616_v3, %v3615_v41  ;;  %v2142_v10 = vpack.c.bf16 %v2120_v20, %v2119_v38 }
 0x2cd   : > { %v4212_v32 = vpop.eup %4211  ;;  %4225 = vrcp.f32 %v2028_v7  ;;  %v3618_v14 = vpop.f32.mrf.mxu1 }
 0x2ce   : > { %v2029_v5 = vadd.f32 1.0, %v4212_v32  ;;  %v3266_v11 = vmul.f32 -1.442695, %v5410_v6  ;;  %v1737_v8 = vadd.f32 %v3617_v34, %v5275_v35  ;;  %3801 = vmatmul.mubr.bf16.gmra.mxu0 %v2142_v10  ;;  %v4214_v17 = vpop.eup %4213 }
 0x2cf   : > { %v3619_v26 = vpop.f32.mrf.mxu1  ;;  %v2121_v48 = vmul.f32 %v4214_v17, %v5370_v12 }
 0x2d0   : > { %v5414_v63 = vadd.f32 %v1897_v4, %v1737_v8  ;;  %v3620_v19 = vadd.f32 %v3619_v26, %v3618_v14  ;;  %4227 = vpow2.f32 %v3266_v11  ;;  %v5432_v8 = vld [vmem:[%s5837_s6] ss:$0 sm:$0xff] }
 0x2d1   : > { %v4216_v16 = vpop.eup %4215  ;;  %v3621_v45 = vpop.f32.mrf.mxu1  ;;  %4229 = vrcp.f32 %v2029_v5 }
 0x2d2   : > { %v4218_v9 = vpop.eup %4217  ;;  %v2030_v28 = vadd.f32 1.0, %v4216_v16  ;;  %v3267_v39 = vmul.f32 -1.442695, %v5414_v63  ;;  %v1742_v51 = vadd.f32 %v3620_v19, %v5275_v35 }
 0x2d3   : > { %v3622_v49 = vpop.f32.mrf.mxu1  ;;  %v2122_v13 = vmul.f32 %v4218_v9, %v5374_v1 }
 0x2d4   : > { %4231 = vrcp.f32 %v2030_v28  ;;  %v1903_v2 = vadd.f32 %v3766_v31, %v1742_v51  ;;  %v3623_v36 = vadd.f32 %v3622_v49, %v3621_v45 }
 0x2d5   : > { %v4220_v21 = vpop.eup %4219  ;;  %4233 = vpow2.f32 %v3267_v39  ;;  %v2143_v37 = vpack.c.bf16 %v2122_v13, %v2121_v48 }
 0x2d6   : > { %v2031_v57 = vadd.f32 1.0, %v4220_v21  ;;  %v3268_v52 = vmul.f32 -1.442695, %v1903_v2  ;;  %v1745_v46 = vadd.f32 %v3623_v36, %v5275_v35  ;;  %v4222_v24 = vpop.eup %4221 }
 0x2d7   : > { %3804 = vmatprep.mubr.bf16.mxu0 %v2143_v37  ;;  %v2123_v1 = vmul.f32 %v4222_v24, %v5380_v55 }
 0x2d8   : > { %v1906_v43 = vadd.f32 %v3767_v62, %v1745_v46  ;;  %4235 = vpow2.f32 %v3268_v52 }
 0x2d9   : > { %v4224_v42 = vpop.eup %4223  ;;  %4237 = vrcp.f32 %v2031_v57 }
 0x2da   : > { %v4226_v15 = vpop.eup %4225  ;;  %v2032_v12 = vadd.f32 1.0, %v4224_v42  ;;  %v3269_v22 = vmul.f32 -1.442695, %v1906_v43 }
 0x2db   : > { %v2124_v31 = vmul.f32 %v4226_v15, %v5384_v23 }
 0x2dc   : > { %4239 = vrcp.f32 %v2032_v12 }
 0x2dd   : > { %4241 = vpow2.f32 %v3269_v22  ;;  %v2144_v44 = vpack.c.bf16 %v2124_v31, %v2123_v1  ;;  %v4228_v25 = vpop.eup %4227 }
 0x2de   : > { %v4230_v29 = vpop.eup %4229  ;;  %v2033_v58 = vadd.f32 1.0, %v4228_v25 }
 0x2df   : > { %3805 = vmatmul.mubr.bf16.gmra.mxu0 %v2144_v44  ;;  %v2125_v50 = vmul.f32 %v4230_v29, %v5390_v33  ;;  %v5472_v44 = vld [vmem:[%s5838_s7] sm:$0xff] }
 0x2e0   : > { %4243 = vrcp.f32 %v2033_v58 }
 0x2e1   : > { %v4232_v35 = vpop.eup %4231 }
 0x2e2   : > { %v4234_v59 = vpop.eup %4233  ;;  %v2126_v56 = vmul.f32 %v4232_v35, %v5394_v40 }
 0x2e3   : > { %v2034_v54 = vadd.f32 1.0, %v4234_v59 }
 0x2e4   : > { %v2145_v30 = vpack.c.bf16 %v2126_v56, %v2125_v50 }
 0x2e5   : > { %4245 = vrcp.f32 %v2034_v54  ;;  %v4236_v55 = vpop.eup %4235 }
 0x2e6   : > { %3808 = vmatprep.mubr.bf16.mxu0 %v2145_v30  ;;  %v4238_v23 = vpop.eup %4237  ;;  %v2035_v27 = vadd.f32 1.0, %v4236_v55 }
 0x2e7   : > { %v2127_v0 = vmul.f32 %v4238_v23, %v5400_v47 }
 0x2e8   : > { %4247 = vrcp.f32 %v2035_v27 }
 0x2e9   : > { %v4240_v53 = vpop.eup %4239 }
 0x2ea   : > { %v4242_v41 = vpop.eup %4241  ;;  %v2128_v60 = vmul.f32 %v4240_v53, %v5404_v18 }
 0x2eb   : > { %v2036_v61 = vadd.f32 1.0, %v4242_v41 }
 0x2ec   : > { %v2146_v38 = vpack.c.bf16 %v2128_v60, %v2127_v0 }
 0x2ed   : > { %4249 = vrcp.f32 %v2036_v61  ;;  %v4244_v33 = vpop.eup %4243 }
 0x2ee   : > { %3809 = vmatmul.mubr.bf16.gmra.mxu0 %v2146_v38  ;;  %v2129_v20 = vmul.f32 %v4244_v33, %v5410_v6 }
 0x2f2   : > { %v4246_v40 = vpop.eup %4245 }
 0x2f3   : > { %v2130_v62 = vmul.f32 %v4246_v40, %v5414_v63 }
 0x2f5   : > { %v2147_v7 = vpack.c.bf16 %v2130_v62, %v2129_v20  ;;  %v4248_v3 = vpop.eup %4247 }
 0x2f6   : > { %v2131_v10 = vmul.f32 %v4248_v3, %v1903_v2 }
 0x2f7   : > { %3812 = vmatprep.mubr.bf16.mxu0 %v2147_v7 }
 0x2fa   : > { %v4250_v34 = vpop.eup %4249 }
 0x2fb   : > { %v2132_v32 = vmul.f32 %v4250_v34, %v1906_v43 }
 0x2fd   : > { %v2148_v47 = vpack.c.bf16 %v2132_v32, %v2131_v10 }
 0x2ff   : > { %3813 = vmatmul.mubr.bf16.gmra.mxu0 %v2148_v47 }
 0x34e   : > { %v3786_v18 = vpop.f32.mrf.mxu0 }
 0x34f   : > { %v5443_v17 = vadd.f32 %v3786_v18, %v5432_v8 }
 0x350   : > { %v2254_v14 = vpop.f32.mrf.mxu0 }
 0x351   : > { %v5438_v4 = vadd.f32 %v5432_v8, %v2254_v14 }
 0x352   : > { %v3787_v5 = vpop.f32.mrf.mxu0 }
 0x353   : > { %v5447_v45 = vadd.f32 %v3787_v5, %v5432_v8 }
 0x354   : > { %v2257_v11 = vpop.f32.mrf.mxu0 }
 0x355   : > { %v5435_v6 = vadd.f32 %v5432_v8, %v2257_v11 }
 0x357   : > { %v2381_v26 = vadd.f32 %v5435_v6, %v5438_v4 }
 0x359   : > { %v2382_v19 = vadd.f32 %v2381_v26, %v5443_v17 }
 0x35b   : > { %v2383_v39 = vadd.f32 %v2382_v19, %v5447_v45 }
 0x35f   : > { %v3790_v63 = vpop.f32.mrf.mxu0 }
 0x360   : > { %v5458_v13 = vadd.f32 %v3790_v63, %v5432_v8 }
 0x361   : > { %v2270_v16 = vpop.f32.mrf.mxu0 }
 0x362   : > { %v5450_v9 = vadd.f32 %v5432_v8, %v2270_v16 }
 0x363   : > { %v3791_v28 = vpop.f32.mrf.mxu0 }
 0x364   : > { %v2384_v49 = vadd.f32 %v2383_v39, %v5450_v9  ;;  %v5462_v36 = vadd.f32 %v3791_v28, %v5432_v8 }
 0x365   : > { %v2273_v51 = vpop.f32.mrf.mxu0 }
 0x366   : > { %v5455_v48 = vadd.f32 %v5432_v8, %v2273_v51 }
 0x368   : > { %v2385_v2 = vadd.f32 %v2384_v49, %v5455_v48 }
 0x36a   : > { %v2386_v21 = vadd.f32 %v2385_v2, %v5458_v13 }
 0x36c   : > { %v2387_v37 = vadd.f32 %v2386_v21, %v5462_v36 }
 0x36e   : > { %v3794_v57 = vpop.f32.mrf.mxu0  ;;  %v2388_v52 = vrot.slane %v2387_v37, 4 }
 0x36f   : > { %v5481_v59 = vadd.f32 %v3794_v57, %v5432_v8 }
 0x370   : > { %v2286_v46 = vpop.f32.mrf.mxu0  ;;  %v2389_v24 = vadd.f32 %v2388_v52, %v2387_v37 }
 0x371   : > { %v5475_v25 = vadd.f32 %v5432_v8, %v2286_v46 }
 0x372   : > { %v3795_v43 = vpop.f32.mrf.mxu0  ;;  %v2390_v42 = vrot.slane %v2389_v24, 2 }
 0x373   : > { %v5485_v30 = vadd.f32 %v3795_v43, %v5432_v8 }
 0x374   : > { %v2391_v15 = vadd.f32 %v2390_v42, %v2389_v24  ;;  %v2289_v12 = vpop.f32.mrf.mxu0 }
 0x375   : > { %v5467_v1 = vadd.f32 %v5432_v8, %v2289_v12 }
 0x376   : > { %v2392_v22 = vrot.slane %v2391_v15, 1 }
 0x377   : > { %v2394_v58 = vadd.f32 %v5467_v1, %v5475_v25 }
 0x378   : > { %v2393_v31 = vadd.f32 %v2392_v22, %v2391_v15 }
 0x379   : > { %v2395_v56 = vadd.f32 %v2394_v58, %v5481_v59 }
 0x37a   : > { %v2434_v29 = vmul.f32 0.015625, %v2393_v31 }
 0x37b   : > { %v2396_v27 = vadd.f32 %v2395_v56, %v5485_v30 }
 0x37c   : > { %v2439_v35 = vmul.f32 %v5472_v44, %v2434_v29 }
 0x37e   : > { %2443 = vadd.xlane.f32.xlu0 %v2439_v35 }
 0x37f   : > { %v3798_v50 = vpop.f32.mrf.mxu0 }
 0x380   : > { %v5496_v60 = vadd.f32 %v3798_v50, %v5432_v8 }
 0x381   : > { %v2302_v54 = vpop.f32.mrf.mxu0 }
 0x382   : > { %v5488_v55 = vadd.f32 %v5432_v8, %v2302_v54 }
 0x383   : > { %v3799_v23 = vpop.f32.mrf.mxu0 }
 0x384   : > { %v2397_v41 = vadd.f32 %v2396_v27, %v5488_v55  ;;  %v5500_v38 = vadd.f32 %v3799_v23, %v5432_v8 }
 0x385   : > { %v2305_v53 = vpop.f32.mrf.mxu0 }
 0x386   : > { %v5493_v0 = vadd.f32 %v5432_v8, %v2305_v53 }
 0x388   : > { %v2398_v61 = vadd.f32 %v2397_v41, %v5493_v0 }
 0x38a   : > { %v2399_v33 = vadd.f32 %v2398_v61, %v5496_v60 }
 0x38c   : > { %v2400_v40 = vadd.f32 %v2399_v33, %v5500_v38 }
 0x38e   : > { %v2401_v20 = vrot.slane %v2400_v40, 4  ;;  %v3802_v62 = vpop.f32.mrf.mxu0 }
 0x38f   : > { %v5514_v16 = vadd.f32 %v3802_v62, %v5432_v8 }
 0x390   : > { %v2318_v7 = vpop.f32.mrf.mxu0  ;;  %v2402_v3 = vadd.f32 %v2401_v20, %v2400_v40 }
 0x391   : > { %v5508_v11 = vadd.f32 %v5432_v8, %v2318_v7 }
 0x392   : > { %v3803_v34 = vpop.f32.mrf.mxu0  ;;  %v2403_v10 = vrot.slane %v2402_v3, 2 }
 0x393   : > { %v5518_v49 = vadd.f32 %v3803_v34, %v5432_v8 }
 0x394   : > { %v2404_v32 = vadd.f32 %v2403_v10, %v2402_v3  ;;  %v2321_v47 = vpop.f32.mrf.mxu0 }
 0x395   : > { %v5505_v14 = vadd.f32 %v5432_v8, %v2321_v47 }
 0x396   : > { %v2405_v18 = vrot.slane %v2404_v32, 1 }
 0x397   : > { %v2407_v63 = vadd.f32 %v5505_v14, %v5508_v11 }
 0x398   : > { %v2406_v5 = vadd.f32 %v2405_v18, %v2404_v32 }
 0x399   : > { %v2408_v39 = vadd.f32 %v2407_v63, %v5514_v16 }
 0x39a   : > { %v2435_v26 = vmul.f32 0.015625, %v2406_v5 }
 0x39b   : > { %v2409_v37 = vadd.f32 %v2408_v39, %v5518_v49 }
 0x39c   : > { %v2440_v19 = vmul.f32 %v5472_v44, %v2435_v26 }
 0x39e   : > { %2445 = vadd.xlane.f32.xlu0 %v2440_v19 }
 0x39f   : > { %v3806_v28 = vpop.f32.mrf.mxu0 }
 0x3a0   : > { %v5529_v24 = vadd.f32 %v3806_v28, %v5432_v8 }
 0x3a1   : > { %v2334_v51 = vpop.f32.mrf.mxu0 }
 0x3a2   : > { %v5521_v2 = vadd.f32 %v5432_v8, %v2334_v51 }
 0x3a3   : > { %v3807_v21 = vpop.f32.mrf.mxu0 }
 0x3a4   : > { %v2410_v52 = vadd.f32 %v2409_v37, %v5521_v2  ;;  %v5533_v42 = vadd.f32 %v3807_v21, %v5432_v8 }
 0x3a5   : > { %v2337_v57 = vpop.f32.mrf.mxu0 }
 0x3a6   : > { %v5526_v46 = vadd.f32 %v5432_v8, %v2337_v57 }
 0x3a8   : > { %v2411_v43 = vadd.f32 %v2410_v52, %v5526_v46 }
 0x3aa   : > { %v2412_v15 = vadd.f32 %v2411_v43, %v5529_v24 }
 0x3ac   : > { %v2413_v12 = vadd.f32 %v2412_v15, %v5533_v42 }
 0x3ae   : > { %v3810_v22 = vpop.f32.mrf.mxu0  ;;  %v2414_v31 = vrot.slane %v2413_v12, 4 }
 0x3af   : > { %v5547_v20 = vadd.f32 %v3810_v22, %v5432_v8 }
 0x3b0   : > { %v2350_v29 = vpop.f32.mrf.mxu0  ;;  %v2415_v58 = vadd.f32 %v2414_v31, %v2413_v12 }
 0x3b1   : > { %v5541_v41 = vadd.f32 %v5432_v8, %v2350_v29 }
 0x3b2   : > { %v3811_v35 = vpop.f32.mrf.mxu0  ;;  %v2416_v50 = vrot.slane %v2415_v58, 2 }
 0x3b3   : > { %v5551_v34 = vadd.f32 %v3811_v35, %v5432_v8 }
 0x3b4   : > { %v2417_v56 = vadd.f32 %v2416_v50, %v2415_v58  ;;  %v2353_v54 = vpop.f32.mrf.mxu0  ;;  %v5571_v50 = vld [vmem:[#allocation10] sm:$0xff] }
 0x3b5   : > { %v5538_v27 = vadd.f32 %v5432_v8, %v2353_v54 }
 0x3b6   : > { %v2418_v23 = vrot.slane %v2417_v56, 1 }
 0x3b7   : > { %v2420_v33 = vadd.f32 %v5538_v27, %v5541_v41 }
 0x3b8   : > { %v2419_v53 = vadd.f32 %v2418_v23, %v2417_v56 }
 0x3b9   : > { %v2421_v7 = vadd.f32 %v2420_v33, %v5547_v20 }
 0x3ba   : > { %v2436_v61 = vmul.f32 0.015625, %v2419_v53 }
 0x3bb   : > { %v2422_v47 = vadd.f32 %v2421_v7, %v5551_v34 }
 0x3bc   : > { %v2441_v40 = vmul.f32 %v5472_v44, %v2436_v61 }
 0x3be   : > { %2447 = vadd.xlane.f32.xlu1 %v2441_v40 }
 0x3bf   : > { %v3814_v62 = vpop.f32.mrf.mxu0 }
 0x3c0   : > { %v5562_v63 = vadd.f32 %v3814_v62, %v5432_v8 }
 0x3c1   : > { %v2366_v3 = vpop.f32.mrf.mxu0 }
 0x3c2   : > { %v5554_v10 = vadd.f32 %v5432_v8, %v2366_v3 }
 0x3c3   : > { %v3815_v32 = vpop.f32.mrf.mxu0 }
 0x3c4   : > { %v2423_v5 = vadd.f32 %v2422_v47, %v5554_v10  ;;  %v5566_v28 = vadd.f32 %v3815_v32, %v5432_v8 }
 0x3c5   : > { %v2369_v18 = vpop.f32.mrf.mxu0 }
 0x3c6   : > { %v5559_v26 = vadd.f32 %v5432_v8, %v2369_v18 }
 0x3c8   : > { %v2424_v19 = vadd.f32 %v2423_v5, %v5559_v26 }
 0x3ca   : > { %v2425_v39 = vadd.f32 %v2424_v19, %v5562_v63 }
 0x3cc   : > { %v2426_v51 = vadd.f32 %v2425_v39, %v5566_v28 }
 0x3ce   : > { %v2427_v21 = vrot.slane %v2426_v51, 4 }
 0x3d0   : > { %v2428_v37 = vadd.f32 %v2427_v21, %v2426_v51 }
 0x3d2   : > { %v2429_v57 = vrot.slane %v2428_v37, 2 }
 0x3d4   : > { %v2430_v52 = vadd.f32 %v2429_v57, %v2428_v37 }
 0x3d6   : > { %v2431_v43 = vrot.slane %v2430_v52, 1 }
 0x3d8   : > { %v2432_v15 = vadd.f32 %v2431_v43, %v2430_v52 }
 0x3da   : > { %v2437_v12 = vmul.f32 0.015625, %v2432_v15 }
 0x3dc   : > { %v2442_v22 = vmul.f32 %v5472_v44, %v2437_v12  ;;  %v4411_v12 = vld [vmem:[%s4854_s27] sm:$0xff]  }
 0x3de   : > { %2449 = vadd.xlane.f32.xlu1 %v2442_v22  ;;  %v2564_v22 = vunpack.c.l.bf16 %v4411_v12 }
 0x407   : > { %v2444_v31 = vpop.xlane.xlu0 %2443 }
 0x408   : > { %v3279_v29 = vmul.f32 -1.442695, %v2444_v31 }
 0x40a   : > { %4251 = vpow2.f32 %v3279_v29  ;;  %v2565_v29 = vunpack.c.h.bf16 %v4411_v12 }
 0x417   : > { %v4252_v58 = vpop.eup %4251 }
 0x418   : > { %v2463_v8 = vadd.f32 1.0, %v4252_v58  ;;  %v4412_v58 = vld [vmem:[%s4854_s27 + $0x8] sm:$0xff]  }
 0x41a   : > { %4253 = vrcp.f32 %v2463_v8  ;;  %v2566_v8 = vunpack.c.l.bf16 %v4412_v58 }
 0x427   : > { %v4254_v35 = vpop.eup %4253  ;;  %v2446_v56 = vpop.xlane.xlu0 %2445 }
 0x428   : > { %v2475_v54 = vmul.f32 %v4254_v35, %v2444_v31  ;;  %v3280_v23 = vmul.f32 -1.442695, %v2446_v56  ;;  %v2567_v35 = vunpack.c.h.bf16 %v4412_v58 }
 0x42a   : > { %v2480_v53 = vmul.f32 %v5571_v50, %v2475_v54  ;;  %4255 = vpow2.f32 %v3280_v23  ;;  %v4413_v54 = vld [vmem:[%s4854_s27 + $0x10] sm:$0xff]  }
 0x42b   : > { %v2568_v23 = vunpack.c.l.bf16 %v4413_v54 }
 0x42c   : > { %v2484_v61 = vrot.slane %v2480_v53, 4 }
 0x42e   : > { %v2485_v33 = vadd.f32 %v2484_v61, %v2480_v53  ;;  %v4414_v61 = vld [vmem:[%s4854_s27 + $0x18] sm:$0xff]  }
 0x430   : > { %v2486_v40 = vrot.slane %v2485_v33, 2 }
 0x432   : > { %v2487_v44 = vadd.f32 %v2486_v40, %v2485_v33  ;;  %v2570_v33 = vunpack.c.l.bf16 %v4414_v61  ;;  %v2571_v40 = vunpack.c.h.bf16 %v4414_v61 }
 0x434   : > { %v2488_v62 = vrot.slane %v2487_v44, 1 }
 0x436   : > { %v2489_v7 = vadd.f32 %v2488_v62, %v2487_v44 }
 0x437   : > { %v4256_v3 = vpop.eup %4255 }
 0x438   : > { %v3283_v32 = vmul.f32 -1.442695, %v2489_v7  ;;  %v2464_v47 = vadd.f32 1.0, %v4256_v3 }
 0x43a   : > { %4257 = vpow2.f32 %v3283_v32 }
 0x43b   : > { %4259 = vrcp.f32 %v2464_v47 }
 0x447   : > { %v4258_v18 = vpop.eup %4257  ;;  %v5574_v5 = vpop.xlane.xlu1 %2447 }
 0x448   : > { %v4260_v19 = vpop.eup %4259  ;;  %v2520_v39 = vadd.f32 1.0, %v4258_v18  ;;  %v3281_v51 = vmul.f32 -1.442695, %v5574_v5 }
 0x449   : > { %v2476_v21 = vmul.f32 %v4260_v19, %v2446_v56  ;;  %v2569_v56 = vunpack.c.h.bf16 %v4413_v54 }
 0x44a   : > { %4261 = vrcp.f32 %v2520_v39 }
 0x44b   : > { %v2481_v37 = vmul.f32 %v5571_v50, %v2476_v21  ;;  %4263 = vpow2.f32 %v3281_v51 }
 0x44d   : > { %v2490_v57 = vrot.slane %v2481_v37, 4 }
 0x44f   : > { %v2491_v52 = vadd.f32 %v2490_v57, %v2481_v37 }
 0x451   : > { %v2492_v43 = vrot.slane %v2491_v52, 2 }
 0x453   : > { %v2493_v15 = vadd.f32 %v2492_v43, %v2491_v52 }
 0x455   : > { %v2494_v31 = vrot.slane %v2493_v15, 1 }
 0x457   : > { %v4262_v53 = vpop.eup %4261  ;;  %v2495_v44 = vadd.f32 %v2494_v31, %v2493_v15 }
 0x458   : > { %v4264_v62 = vpop.eup %4263  ;;  %v2532_v7 = vmul.f32 %v4262_v53, %v5438_v4  ;;  %v2533_v3 = vmul.f32 %v4262_v53, %v5435_v6  ;;  %v2534_v32 = vmul.f32 %v4262_v53, %v5443_v17  ;;  %v2535_v47 = vmul.f32 %v4262_v53, %v5447_v45 }
 0x459   : > { %v3284_v18 = vmul.f32 -1.442695, %v2495_v44  ;;  %v2465_v19 = vadd.f32 1.0, %v4264_v62  ;;  %v2536_v39 = vmul.f32 %v4262_v53, %v5450_v9  ;;  %v2537_v51 = vmul.f32 %v4262_v53, %v5455_v48 }
 0x45a   : > { %v2538_v21 = vmul.f32 %v4262_v53, %v5458_v13  ;;  %v2539_v37 = vmul.f32 %v4262_v53, %v5462_v36  ;;  %v5590_v57 = vadd.f32 %v2564_v22, %v2532_v7  ;;  %v5592_v52 = vadd.f32 %v2565_v29, %v2533_v3 }
 0x45b   : > { %4265 = vpow2.f32 %v3284_v18  ;;  %v5594_v6 = vadd.f32 %v2566_v8, %v2534_v32  ;;  %v5596_v4 = vadd.f32 %v2567_v35, %v2535_v47  ;;  %v5598_v17 = vadd.f32 %v2568_v23, %v2536_v39 }
 0x45c   : > { %4267 = vrcp.f32 %v2465_v19  ;;  %v5600_v45 = vadd.f32 %v2569_v56, %v2537_v51  ;;  %v5602_v9 = vadd.f32 %v2570_v33, %v2538_v21  ;;  %v3287_v48 = vmul.f32 -1.442695, %v5590_v57 }
 0x45d   : > { %v3288_v13 = vmul.f32 -1.442695, %v5592_v52  ;;  %v3289_v36 = vmul.f32 -1.442695, %v5594_v6  ;;  %v5607_v43 = vadd.f32 %v2571_v40, %v2539_v37  ;;  %v3290_v15 = vmul.f32 -1.442695, %v5596_v4 }
 0x45e   : > { %4269 = vpow2.f32 %v3287_v48  ;;  %v3291_v12 = vmul.f32 -1.442695, %v5598_v17  ;;  %v3292_v22 = vmul.f32 -1.442695, %v5600_v45  ;;  %v3293_v31 = vmul.f32 -1.442695, %v5602_v9 }
 0x45f   : > { %4271 = vpow2.f32 %v3288_v13  ;;  %v3294_v29 = vmul.f32 -1.442695, %v5607_v43 }
 0x460   : > { %4273 = vpow2.f32 %v3289_v36 }
 0x461   : > { %4275 = vpow2.f32 %v3290_v15 }
 0x462   : > { %4277 = vpow2.f32 %v3291_v12  ;;  %v4415_v12 = vld [vmem:[%s4854_s27 + $0x20] sm:$0xff]  }
 0x463   : > { %4279 = vpow2.f32 %v3292_v22  ;;  %v2572_v22 = vunpack.c.l.bf16 %v4415_v12 }
 0x464   : > { %4281 = vpow2.f32 %v3293_v31  ;;  %v2573_v31 = vunpack.c.h.bf16 %v4415_v12 }
 0x465   : > { %4283 = vpow2.f32 %v3294_v29 }
 0x467   : > { %v5614_v58 = vpop.xlane.xlu1 %2449 }
 0x468   : > { %v4266_v8 = vpop.eup %4265  ;;  %v3282_v35 = vmul.f32 -1.442695, %v5614_v58 }
 0x469   : > { %v4268_v54 = vpop.eup %4267  ;;  %v2521_v23 = vadd.f32 1.0, %v4266_v8 }
 0x46a   : > { %v2477_v53 = vmul.f32 %v4268_v54, %v5574_v5  ;;  %4285 = vpow2.f32 %v3282_v35  ;;  %v4416_v35 = vld [vmem:[%s4854_s27 + $0x28] sm:$0xff]  }
 0x46b   : > { %4287 = vrcp.f32 %v2521_v23  ;;  %v4270_v56 = vpop.eup %4269  ;;  %v2574_v54 = vunpack.c.l.bf16 %v4416_v35  ;;  %v2575_v23 = vunpack.c.h.bf16 %v4416_v35 }
 0x46c   : > { %v2482_v61 = vmul.f32 %v5571_v50, %v2477_v53  ;;  %v4272_v33 = vpop.eup %4271  ;;  %v2724_v40 = vadd.f32 1.0, %v4270_v56  ;;  %v4417_v53 = vld [vmem:[%s4854_s27 + $0x30] sm:$0xff]  }
 0x46d   : > { %v4274_v44 = vpop.eup %4273  ;;  %v2725_v7 = vadd.f32 1.0, %v4272_v33  ;;  %v2576_v56 = vunpack.c.l.bf16 %v4417_v53 }
 0x46e   : > { %v2496_v62 = vrot.slane %v2482_v61, 4  ;;  %v4276_v3 = vpop.eup %4275  ;;  %v2726_v32 = vadd.f32 1.0, %v4274_v44  ;;  %4289 = vrcp.f32 %v2724_v40  ;;  %v4418_v40 = vld [vmem:[%s4854_s27 + $0x38] sm:$0xff]  }
 0x46f   : > { %v4278_v47 = vpop.eup %4277  ;;  %v2727_v19 = vadd.f32 1.0, %v4276_v3  ;;  %4291 = vrcp.f32 %v2725_v7  ;;  %v2578_v44 = vunpack.c.l.bf16 %v4418_v40 }
 0x470   : > { %v2497_v18 = vadd.f32 %v2496_v62, %v2482_v61  ;;  %v4280_v39 = vpop.eup %4279  ;;  %v2728_v5 = vadd.f32 1.0, %v4278_v47  ;;  %4293 = vrcp.f32 %v2726_v32  ;;  %v2577_v61 = vunpack.c.h.bf16 %v4417_v53 }
 0x471   : > { %v4282_v51 = vpop.eup %4281  ;;  %v2729_v37 = vadd.f32 1.0, %v4280_v39  ;;  %4295 = vrcp.f32 %v2727_v19  ;;  %v2579_v62 = vunpack.c.h.bf16 %v4418_v40 }
 0x472   : > { %v2498_v21 = vrot.slane %v2497_v18, 2  ;;  %v4284_v48 = vpop.eup %4283  ;;  %v2730_v13 = vadd.f32 1.0, %v4282_v51  ;;  %4297 = vrcp.f32 %v2728_v5 }
 0x473   : > { %v2731_v15 = vadd.f32 1.0, %v4284_v48  ;;  %4299 = vrcp.f32 %v2729_v37 }
 0x474   : > { %v2499_v36 = vadd.f32 %v2498_v21, %v2497_v18  ;;  %4301 = vrcp.f32 %v2730_v13 }
 0x475   : > { %4303 = vrcp.f32 %v2731_v15 }
 0x476   : > { %v2500_v29 = vrot.slane %v2499_v36, 1 }
 0x477   : > { %v4286_v8 = vpop.eup %4285 }
 0x478   : > { %v4288_v33 = vpop.eup %4287  ;;  %v2501_v7 = vadd.f32 %v2500_v29, %v2499_v36  ;;  %v2466_v3 = vadd.f32 1.0, %v4286_v8 }
 0x479   : > { %v2540_v32 = vmul.f32 %v4288_v33, %v5475_v25  ;;  %v2541_v47 = vmul.f32 %v4288_v33, %v5467_v1  ;;  %v2542_v18 = vmul.f32 %v4288_v33, %v5481_v59  ;;  %v2543_v19 = vmul.f32 %v4288_v33, %v5485_v30 }
 0x47a   : > { %v3285_v39 = vmul.f32 -1.442695, %v2501_v7  ;;  %4305 = vrcp.f32 %v2466_v3  ;;  %v2544_v5 = vmul.f32 %v4288_v33, %v5488_v55  ;;  %v2545_v51 = vmul.f32 %v4288_v33, %v5493_v0 }
 0x47b   : > { %v2546_v21 = vmul.f32 %v4288_v33, %v5496_v60  ;;  %v2547_v37 = vmul.f32 %v4288_v33, %v5500_v38  ;;  %v5631_v48 = vadd.f32 %v2572_v22, %v2540_v32  ;;  %v5633_v13 = vadd.f32 %v2573_v31, %v2541_v47  ;;  %v4290_v25 = vpop.eup %4289 }
 0x47c   : > { %4307 = vpow2.f32 %v3285_v39  ;;  %v5635_v1 = vadd.f32 %v2574_v54, %v2542_v18  ;;  %v5637_v59 = vadd.f32 %v2575_v23, %v2543_v19  ;;  %v5639_v30 = vadd.f32 %v2576_v56, %v2544_v5  ;;  %v4292_v36 = vpop.eup %4291 }
 0x47d   : > { %v5641_v55 = vadd.f32 %v2577_v61, %v2545_v51  ;;  %v5643_v0 = vadd.f32 %v2578_v44, %v2546_v21  ;;  %v5645_v60 = vadd.f32 %v2579_v62, %v2547_v37  ;;  %v3295_v38 = vmul.f32 -1.442695, %v5631_v48  ;;  %v4294_v15 = vpop.eup %4293 }
 0x47e   : > { %v3296_v12 = vmul.f32 -1.442695, %v5633_v13  ;;  %v3297_v22 = vmul.f32 -1.442695, %v5635_v1  ;;  %v3298_v31 = vmul.f32 -1.442695, %v5637_v59  ;;  %v2820_v29 = vmul.f32 %v4290_v25, %v5590_v57  ;;  %v4296_v8 = vpop.eup %4295 }
 0x47f   : > { %4309 = vpow2.f32 %v3295_v38  ;;  %v3299_v35 = vmul.f32 -1.442695, %v5639_v30  ;;  %v4298_v54 = vpop.eup %4297  ;;  %v3300_v23 = vmul.f32 -1.442695, %v5641_v55  ;;  %v2821_v53 = vmul.f32 %v4292_v36, %v5592_v52 }
 0x480   : > { %4311 = vpow2.f32 %v3296_v12  ;;  %v2822_v56 = vmul.f32 %v4294_v15, %v5594_v6  ;;  %v4300_v61 = vpop.eup %4299  ;;  %v3301_v33 = vmul.f32 -1.442695, %v5643_v0  ;;  %v2823_v40 = vmul.f32 %v4296_v8, %v5596_v4 }
 0x481   : > { %4313 = vpow2.f32 %v3297_v22  ;;  %v2824_v57 = vmul.f32 %v4298_v54, %v5598_v17  ;;  %v4302_v44 = vpop.eup %4301  ;;  %v3302_v62 = vmul.f32 -1.442695, %v5645_v60  ;;  %v2825_v7 = vmul.f32 %v4300_v61, %v5600_v45 }
 0x482   : > { %4315 = vpow2.f32 %v3298_v31  ;;  %v3396_v3 = vpack.c.bf16 %v2821_v53, %v2820_v29  ;;  %v4304_v32 = vpop.eup %4303  ;;  %v2826_v52 = vmul.f32 %v4302_v44, %v5602_v9  ;;  %v3401_v6 = vpack.c.bf16 %v2823_v40, %v2822_v56  ;;  %v4420_v44 = vld [vmem:[%s4854_s27 + $0x48] sm:$0xff]  }
 0x483   : > { %4317 = vpow2.f32 %v3299_v35  ;;  %v2827_v47 = vmul.f32 %v4304_v32, %v5607_v43  ;;  %v3406_v4 = vpack.c.bf16 %v2825_v7, %v2824_v57  ;;  %v2583_v7 = vunpack.c.h.bf16 %v4420_v44 }
 0x484   : > { %4319 = vpow2.f32 %v3300_v23  ;;  %3397 = vst [vmem:[%s5665_s28] sm:$0xff] %v3396_v3   ;;  %3473 = vst [vmem:[%s5665_s28 + $0x8] sm:$0xff] %v3401_v6  }
 0x485   : > { %4321 = vpow2.f32 %v3301_v33  ;;  %3474 = vst [vmem:[%s5665_s28 + $0x10] sm:$0xff] %v3406_v4   ;;  %v3411_v17 = vpack.c.bf16 %v2827_v47, %v2826_v52  ;;  %v4419_v33 = vld [vmem:[%s4854_s27 + $0x40] sm:$0xff]   ;;  %v4421_v52 = vld [vmem:[%s4854_s27 + $0x50] sm:$0xff]   ;;  %v4422_v4 = vld [vmem:[%s4854_s27 + $0x58] sm:$0xff]  }
 0x486   : > { %4323 = vpow2.f32 %v3302_v62  ;;  %v2580_v40 = vunpack.c.l.bf16 %v4419_v33  ;;  %v2581_v57 = vunpack.c.h.bf16 %v4419_v33  ;;  %v2582_v62 = vunpack.c.l.bf16 %v4420_v44 }
 0x487   : > { %v4306_v45 = vpop.eup %4305  ;;  %3475 = vst [vmem:[%s5665_s28 + $0x18] sm:$0xff] %v3411_v17   ;;  %v2584_v6 = vunpack.c.l.bf16 %v4421_v52  ;;  %v2585_v47 = vunpack.c.h.bf16 %v4421_v52  ;;  %v2586_v17 = vunpack.c.l.bf16 %v4422_v4 }
 0x488   : > { %v2478_v9 = vmul.f32 %v4306_v45, %v5614_v58  ;;  %v2587_v45 = vunpack.c.h.bf16 %v4422_v4 }
 0x489   : > { %v4308_v18 = vpop.eup %4307 }
 0x48a   : > { %v2522_v43 = vadd.f32 1.0, %v4308_v18  ;;  %v2483_v19 = vmul.f32 %v5571_v50, %v2478_v9 }
 0x48c   : > { %v4310_v39 = vpop.eup %4309  ;;  %4325 = vrcp.f32 %v2522_v43  ;;  %v2502_v5 = vrot.slane %v2483_v19, 4 }
 0x48d   : > { %v4312_v51 = vpop.eup %4311  ;;  %v2732_v21 = vadd.f32 1.0, %v4310_v39 }
 0x48e   : > { %v4314_v37 = vpop.eup %4313  ;;  %v2503_v25 = vadd.f32 %v2502_v5, %v2483_v19  ;;  %v2733_v36 = vadd.f32 1.0, %v4312_v51 }
 0x48f   : > { %v4316_v38 = vpop.eup %4315  ;;  %v2734_v15 = vadd.f32 1.0, %v4314_v37  ;;  %4327 = vrcp.f32 %v2732_v21 }
 0x490   : > { %v4318_v12 = vpop.eup %4317  ;;  %v2504_v22 = vrot.slane %v2503_v25, 2  ;;  %v2735_v31 = vadd.f32 1.0, %v4316_v38  ;;  %4329 = vrcp.f32 %v2733_v36 }
 0x491   : > { %v4320_v58 = vpop.eup %4319  ;;  %v2736_v29 = vadd.f32 1.0, %v4318_v12  ;;  %4331 = vrcp.f32 %v2734_v15 }
 0x492   : > { %v4322_v50 = vpop.eup %4321  ;;  %v2505_v8 = vadd.f32 %v2504_v22, %v2503_v25  ;;  %v2737_v35 = vadd.f32 1.0, %v4320_v58  ;;  %4333 = vrcp.f32 %v2735_v31 }
 0x493   : > { %v4324_v54 = vpop.eup %4323  ;;  %v2738_v23 = vadd.f32 1.0, %v4322_v50  ;;  %4335 = vrcp.f32 %v2736_v29 }
 0x494   : > { %v2506_v53 = vrot.slane %v2505_v8, 1  ;;  %v2739_v56 = vadd.f32 1.0, %v4324_v54  ;;  %4337 = vrcp.f32 %v2737_v35 }
 0x495   : > { %4339 = vrcp.f32 %v2738_v23 }
 0x496   : > { %v2507_v61 = vadd.f32 %v2506_v53, %v2505_v8  ;;  %4341 = vrcp.f32 %v2739_v56 }
 0x498   : > { %v3286_v3 = vmul.f32 -1.442695, %v2507_v61 }
 0x499   : > { %v4326_v32 = vpop.eup %4325 }
 0x49a   : > { %4343 = vpow2.f32 %v3286_v3  ;;  %v2548_v9 = vmul.f32 %v4326_v32, %v5508_v11  ;;  %v2549_v18 = vmul.f32 %v4326_v32, %v5505_v14  ;;  %v2550_v43 = vmul.f32 %v4326_v32, %v5514_v16 }
 0x49b   : > { %v2551_v19 = vmul.f32 %v4326_v32, %v5518_v49  ;;  %v2552_v39 = vmul.f32 %v4326_v32, %v5521_v2  ;;  %v2553_v5 = vmul.f32 %v4326_v32, %v5526_v46  ;;  %v2554_v51 = vmul.f32 %v4326_v32, %v5529_v24 }
 0x49c   : > { %v4328_v21 = vpop.eup %4327  ;;  %v2555_v37 = vmul.f32 %v4326_v32, %v5533_v42  ;;  %v5685_v25 = vadd.f32 %v2580_v40, %v2548_v9  ;;  %v5687_v36 = vadd.f32 %v2581_v57, %v2549_v18  ;;  %v5689_v11 = vadd.f32 %v2582_v62, %v2550_v43 }
 0x49d   : > { %v4330_v14 = vpop.eup %4329  ;;  %v5691_v38 = vadd.f32 %v2583_v7, %v2551_v19  ;;  %v5693_v16 = vadd.f32 %v2584_v6, %v2552_v39  ;;  %v5695_v49 = vadd.f32 %v2585_v47, %v2553_v5  ;;  %v5697_v46 = vadd.f32 %v2586_v17, %v2554_v51  ;;  %v4423_v5 = vld [vmem:[%s4854_s27 + $0x60] sm:$0xff]  }
 0x49e   : > { %v4332_v2 = vpop.eup %4331  ;;  %v3303_v24 = vmul.f32 -1.442695, %v5685_v25  ;;  %v3304_v42 = vmul.f32 -1.442695, %v5687_v36  ;;  %v3305_v15 = vmul.f32 -1.442695, %v5689_v11  ;;  %v5702_v22 = vadd.f32 %v2587_v45, %v2555_v37 }
 0x49f   : > { %v4334_v12 = vpop.eup %4333  ;;  %v3306_v31 = vmul.f32 -1.442695, %v5691_v38  ;;  %v2828_v58 = vmul.f32 %v4328_v21, %v5631_v48  ;;  %v3307_v50 = vmul.f32 -1.442695, %v5693_v16  ;;  %v3308_v8 = vmul.f32 -1.442695, %v5695_v49 }
 0x4a0   : > { %v4336_v29 = vpop.eup %4335  ;;  %4345 = vpow2.f32 %v3303_v24  ;;  %v2829_v35 = vmul.f32 %v4330_v14, %v5633_v13  ;;  %v2830_v23 = vmul.f32 %v4332_v2, %v5635_v1  ;;  %v2831_v53 = vmul.f32 %v4334_v12, %v5637_v59  ;;  %v4424_v14 = vld [vmem:[%s4854_s27 + $0x68] sm:$0xff]  }
 0x4a1   : > { %v4338_v54 = vpop.eup %4337  ;;  %4347 = vpow2.f32 %v3304_v42  ;;  %v2832_v56 = vmul.f32 %v4336_v29, %v5639_v30  ;;  %v3309_v48 = vmul.f32 -1.442695, %v5697_v46  ;;  %v3310_v13 = vmul.f32 -1.442695, %v5702_v22  ;;  %v4425_v42 = vld [vmem:[%s4854_s27 + $0x70] sm:$0xff]  }
 0x4a2   : > { %v4340_v61 = vpop.eup %4339  ;;  %4349 = vpow2.f32 %v3305_v15  ;;  %v2833_v33 = vmul.f32 %v4338_v54, %v5641_v55  ;;  %v3416_v40 = vpack.c.bf16 %v2829_v35, %v2828_v58  ;;  %v3421_v44 = vpack.c.bf16 %v2831_v53, %v2830_v23  ;;  %v4426_v58 = vld [vmem:[%s4854_s27 + $0x78] sm:$0xff]   ;;  %s5784_s27 = scalar_lea.hbm %s5840_s9, %s3392_s1 }
 0x4a3   : > { %v4342_v57 = vpop.eup %4341  ;;  %4351 = vpow2.f32 %v3306_v31  ;;  %v2834_v1 = vmul.f32 %v4340_v61, %v5643_v0  ;;  %v2588_v51 = vunpack.c.l.bf16 %v4423_v5  ;;  %v2589_v21 = vunpack.c.h.bf16 %v4423_v5 }
 0x4a4   : > { %4353 = vpow2.f32 %v3307_v50  ;;  %v2835_v59 = vmul.f32 %v4342_v57, %v5645_v60  ;;  %3476 = vst [vmem:[%s5665_s28 + $0x20] sm:$0xff] %v3416_v40   ;;  %v3426_v30 = vpack.c.bf16 %v2833_v33, %v2832_v56  ;;  %3477 = vst [vmem:[%s5665_s28 + $0x28] sm:$0xff] %v3421_v44   ;;  %v2590_v2 = vunpack.c.l.bf16 %v4424_v14 }
 0x4a5   : > { %4355 = vpow2.f32 %v3308_v8  ;;  %v2591_v24 = vunpack.c.h.bf16 %v4424_v14  ;;  %v2592_v15 = vunpack.c.l.bf16 %v4425_v42  ;;  %v2593_v31 = vunpack.c.h.bf16 %v4425_v42 }
 0x4a6   : > { %4357 = vpow2.f32 %v3309_v48  ;;  %3478 = vst [vmem:[%s5665_s28 + $0x30] sm:$0xff] %v3426_v30   ;;  %v3431_v62 = vpack.c.bf16 %v2835_v59, %v2834_v1  ;;  %v2594_v29 = vunpack.c.l.bf16 %v4426_v58  ;;  %v2595_v50 = vunpack.c.h.bf16 %v4426_v58 }
 0x4a7   : > { %v4344_v55 = vpop.eup %4343  ;;  %4359 = vpow2.f32 %v3310_v13 }
 0x4a8   : > { %v2523_v7 = vadd.f32 1.0, %v4344_v55  ;;  %3479 = vst [vmem:[%s5665_s28 + $0x38] sm:$0xff] %v3431_v62  }
 0x4aa   : > { %4361 = vrcp.f32 %v2523_v7 }
 0x4ad   : > { %v4346_v3 = vpop.eup %4345 }
 0x4ae   : > { %v4348_v32 = vpop.eup %4347  ;;  %v2740_v52 = vadd.f32 1.0, %v4346_v3 }
 0x4af   : > { %v4350_v0 = vpop.eup %4349  ;;  %v2741_v6 = vadd.f32 1.0, %v4348_v32 }
 0x4b0   : > { %v4352_v47 = vpop.eup %4351  ;;  %v2742_v60 = vadd.f32 1.0, %v4350_v0  ;;  %4363 = vrcp.f32 %v2740_v52 }
 0x4b1   : > { %v4354_v4 = vpop.eup %4353  ;;  %v2743_v17 = vadd.f32 1.0, %v4352_v47  ;;  %4365 = vrcp.f32 %v2741_v6 }
 0x4b2   : > { %v4356_v45 = vpop.eup %4355  ;;  %v2744_v9 = vadd.f32 1.0, %v4354_v4  ;;  %4367 = vrcp.f32 %v2742_v60 }
 0x4b3   : > { %v4358_v18 = vpop.eup %4357  ;;  %v2745_v43 = vadd.f32 1.0, %v4356_v45  ;;  %4369 = vrcp.f32 %v2743_v17 }
 0x4b4   : > { %v4360_v19 = vpop.eup %4359  ;;  %v2746_v39 = vadd.f32 1.0, %v4358_v18  ;;  %4371 = vrcp.f32 %v2744_v9 }
 0x4b5   : > { %v2747_v37 = vadd.f32 1.0, %v4360_v19  ;;  %4373 = vrcp.f32 %v2745_v43 }
 0x4b6   : > { %4375 = vrcp.f32 %v2746_v39 }
 0x4b7   : > { %v4362_v12 = vpop.eup %4361  ;;  %4377 = vrcp.f32 %v2747_v37 }
 0x4b8   : > { %v2556_v8 = vmul.f32 %v4362_v12, %v5541_v41  ;;  %v2557_v35 = vmul.f32 %v4362_v12, %v5538_v27  ;;  %v2558_v54 = vmul.f32 %v4362_v12, %v5547_v20  ;;  %v2559_v23 = vmul.f32 %v4362_v12, %v5551_v34 }
 0x4b9   : > { %v2560_v53 = vmul.f32 %v4362_v12, %v5554_v10  ;;  %v2561_v56 = vmul.f32 %v4362_v12, %v5559_v26  ;;  %v2562_v61 = vmul.f32 %v4362_v12, %v5562_v63  ;;  %v2563_v48 = vmul.f32 %v4362_v12, %v5566_v28 }
 0x4ba   : > { %v5733_v33 = vadd.f32 %v2588_v51, %v2556_v8  ;;  %v5735_v40 = vadd.f32 %v2589_v21, %v2557_v35  ;;  %v5737_v57 = vadd.f32 %v2590_v2, %v2558_v54  ;;  %v5739_v41 = vadd.f32 %v2591_v24, %v2559_v23 }
 0x4bb   : > { %v5741_v27 = vadd.f32 %v2592_v15, %v2560_v53  ;;  %v5743_v20 = vadd.f32 %v2593_v31, %v2561_v56  ;;  %v5745_v34 = vadd.f32 %v2594_v29, %v2562_v61  ;;  %v5750_v13 = vadd.f32 %v2595_v50, %v2563_v48 }
 0x4bc   : > { %v3311_v10 = vmul.f32 -1.442695, %v5733_v33  ;;  %v3312_v26 = vmul.f32 -1.442695, %v5735_v40  ;;  %v3313_v63 = vmul.f32 -1.442695, %v5737_v57 }
 0x4bd   : > { %v4364_v28 = vpop.eup %4363  ;;  %v3314_v1 = vmul.f32 -1.442695, %v5739_v41  ;;  %v3315_v59 = vmul.f32 -1.442695, %v5741_v27  ;;  %v3316_v55 = vmul.f32 -1.442695, %v5743_v20 }
 0x4be   : > { %v4366_v44 = vpop.eup %4365  ;;  %4379 = vpow2.f32 %v3311_v10  ;;  %v2836_v30 = vmul.f32 %v4364_v28, %v5685_v25  ;;  %v3317_v32 = vmul.f32 -1.442695, %v5745_v34  ;;  %v3318_v6 = vmul.f32 -1.442695, %v5750_v13 }
 0x4bf   : > { %v4368_v62 = vpop.eup %4367  ;;  %4381 = vpow2.f32 %v3312_v26  ;;  %v2837_v7 = vmul.f32 %v4366_v44, %v5687_v36 }
 0x4c0   : > { %v4370_v3 = vpop.eup %4369  ;;  %4383 = vpow2.f32 %v3313_v63  ;;  %v2838_v52 = vmul.f32 %v4368_v62, %v5689_v11 }
 0x4c1   : > { %v4372_v0 = vpop.eup %4371  ;;  %4385 = vpow2.f32 %v3314_v1  ;;  %v2839_v25 = vmul.f32 %v4370_v3, %v5691_v38  ;;  %v3436_v47 = vpack.c.bf16 %v2837_v7, %v2836_v30 }
 0x4c2   : > { %v4374_v60 = vpop.eup %4373  ;;  %4387 = vpow2.f32 %v3315_v59  ;;  %v2840_v36 = vmul.f32 %v4372_v0, %v5693_v16 }
 0x4c3   : > { %v4376_v4 = vpop.eup %4375  ;;  %4389 = vpow2.f32 %v3316_v55  ;;  %v2841_v17 = vmul.f32 %v4374_v60, %v5695_v49  ;;  %3480 = vst [vmem:[%s5665_s28 + $0x40] sm:$0xff] %v3436_v47   ;;  %v3441_v11 = vpack.c.bf16 %v2839_v25, %v2838_v52 }
 0x4c4   : > { %v4378_v45 = vpop.eup %4377  ;;  %4391 = vpow2.f32 %v3317_v32  ;;  %v2842_v9 = vmul.f32 %v4376_v4, %v5697_v46 }
 0x4c5   : > { %4393 = vpow2.f32 %v3318_v6  ;;  %v2843_v38 = vmul.f32 %v4378_v45, %v5702_v22  ;;  %3481 = vst [vmem:[%s5665_s28 + $0x48] sm:$0xff] %v3441_v11   ;;  %v3446_v18 = vpack.c.bf16 %v2841_v17, %v2840_v36 }
 0x4c7   : > { %3482 = vst [vmem:[%s5665_s28 + $0x50] sm:$0xff] %v3446_v18   ;;  %v3451_v43 = vpack.c.bf16 %v2843_v38, %v2842_v9 }
 0x4c9   : > { %3483 = vst [vmem:[%s5665_s28 + $0x58] sm:$0xff] %v3451_v43  }
 0x4cb   : > { %v4380_v19 = vpop.eup %4379 }
 0x4cc   : > { %v4382_v16 = vpop.eup %4381  ;;  %v2748_v39 = vadd.f32 1.0, %v4380_v19 }
 0x4cd   : > { %v4384_v5 = vpop.eup %4383  ;;  %v2749_v51 = vadd.f32 1.0, %v4382_v16 }
 0x4ce   : > { %v4386_v49 = vpop.eup %4385  ;;  %v2750_v21 = vadd.f32 1.0, %v4384_v5  ;;  %4395 = vrcp.f32 %v2748_v39 }
 0x4cf   : > { %v4388_v37 = vpop.eup %4387  ;;  %v2751_v14 = vadd.f32 1.0, %v4386_v49  ;;  %4397 = vrcp.f32 %v2749_v51 }
 0x4d0   : > { %v4390_v46 = vpop.eup %4389  ;;  %v2752_v2 = vadd.f32 1.0, %v4388_v37  ;;  %4399 = vrcp.f32 %v2750_v21 }
 0x4d1   : > { %v4392_v22 = vpop.eup %4391  ;;  %v2753_v24 = vadd.f32 1.0, %v4390_v46  ;;  %4401 = vrcp.f32 %v2751_v14 }
 0x4d2   : > { %v4394_v42 = vpop.eup %4393  ;;  %v2754_v15 = vadd.f32 1.0, %v4392_v22  ;;  %4403 = vrcp.f32 %v2752_v2 }
 0x4d3   : > { %v2755_v12 = vadd.f32 1.0, %v4394_v42  ;;  %4405 = vrcp.f32 %v2753_v24 }
 0x4d4   : > { %4407 = vrcp.f32 %v2754_v15 }
 0x4d5   : > { %4409 = vrcp.f32 %v2755_v12 }
 0x4db   : > { %v4396_v31 = vpop.eup %4395 }
 0x4dc   : > { %v4398_v58 = vpop.eup %4397  ;;  %v2844_v29 = vmul.f32 %v4396_v31, %v5733_v33 }
 0x4dd   : > { %v4400_v50 = vpop.eup %4399  ;;  %v2845_v8 = vmul.f32 %v4398_v58, %v5735_v40 }
 0x4de   : > { %v4402_v35 = vpop.eup %4401  ;;  %v2846_v54 = vmul.f32 %v4400_v50, %v5737_v57 }
 0x4df   : > { %v4404_v23 = vpop.eup %4403  ;;  %v2847_v53 = vmul.f32 %v4402_v35, %v5739_v41  ;;  %v3456_v56 = vpack.c.bf16 %v2845_v8, %v2844_v29 }
 0x4e0   : > { %v4406_v61 = vpop.eup %4405  ;;  %v2848_v48 = vmul.f32 %v4404_v23, %v5741_v27 }
 0x4e1   : > { %v4408_v10 = vpop.eup %4407  ;;  %v2849_v33 = vmul.f32 %v4406_v61, %v5743_v20  ;;  %3484 = vst [vmem:[%s5665_s28 + $0x60] sm:$0xff] %v3456_v56   ;;  %v3461_v26 = vpack.c.bf16 %v2847_v53, %v2846_v54 }
 0x4e2   : > { %v4410_v40 = vpop.eup %4409  ;;  %v2850_v57 = vmul.f32 %v4408_v10, %v5745_v34 }
 0x4e3   : > { %v2851_v41 = vmul.f32 %v4410_v40, %v5750_v13  ;;  %3485 = vst [vmem:[%s5665_s28 + $0x68] sm:$0xff] %v3461_v26   ;;  %v3466_v63 = vpack.c.bf16 %v2849_v33, %v2848_v48 }
 0x4e5   : > { %3486 = vst [vmem:[%s5665_s28 + $0x70] sm:$0xff] %v3466_v63   ;;  %v3471_v27 = vpack.c.bf16 %v2851_v41, %v2850_v57 }
 0x4e7   : > { %3487 = vst [vmem:[%s5665_s28 + $0x78] sm:$0xff] %v3471_v27  }
 0x4e8   : > { %4572 = shalt.err (!%p4569_p5)
}
 0x4e9   : > { %s4573_s21 = scalar_lea.hbm %s5784_s27, 2048  ;;  %s4577_s25 = scalar_lea.hbm %s5840_s9, 4096 }
 0x4ea   : > { %p4574_p6 = scmp.ne.s32.totalorder %s5784_s27, %s4573_s21  ;;  %p4578_p9 = scmp.lt.s32.totalorder %s5784_s27, %s5840_s9 }
 0x4eb   : > { %p4579_p2 = scmp.lt.s32.totalorder %s4577_s25, %s4573_s21 }
 0x4ec   : > { %p4575_p4 = pnand %p4574_p6, %p5869_p12 }
 0x4ed   : > { %p4580_p3 = por %p4579_p2, %p4578_p9 }
 0x4ee   : > { %p4576_p8 = pneg %p4575_p4 }
 0x4f0   : > { %p4581_p10 = pnand %p4580_p3, %p4576_p8 }
 0x4f2   : > { %4584 = shalt.err (!%p4581_p10)
}
 0x4f3   : > { %s4641_s5 = smov 64   ;;  %s4642_s22 = smov 4  }
 0x4f4   : > { %3850 = dma.vmem_to_hbm [thread:$0]  (%p5869_p12), %s5786_s29, 2048, %s5784_s27, %s3013_s13, %s4641_s5, %s4641_s5, %s4642_s22  }
 0x4f5 PF: > { %s3042_s15 = sand.u32 1, %s4619_s30   ;;  %p5870_p7 = scmp.ne.s32.totalorder %s5851_s16, 0 }
 0x4f6   : > { %p5871_p1 = scmp.ge.s32.totalorder %s4631_s12, 2  ;;  %s3043_s17 = scalar_lea.sflag [#allocation4], %s3042_s15 }
 0x4f8   : > { %p3870_p13 = pnand %p5871_p1, %p5870_p7 }
 0x4fa   : > { %p3871_p0 = pneg %p3870_p13 }
 0x4fc   : > { %4614 = dma.done.wait (%p3871_p0), %s3043_s17, 2048  }
 0x4fd   : > { %4616 = vsyncadd (%p3871_p0), %s3043_s17, 4294965248  ;;  %p24_p11 = scmp.ge.s32.totalorder %s4790_s24, 4   ;;  %s5872_s30 = smov %s4623_s10 }
 0x4fe   : > { %s5873_s10 = smov %s4627_s11  ;;  %s5874_s11 = smov %s4806_s23 }
 0x4ff   : > { %s5875_s12 = smov %s4790_s24  ;;  %26 = sbr.rel (!%p24_p11) target bundleno = 11 (0xb), region = 117 }
 0x504   :  { %3048 = vsyncpa [#allocation3], 1 }
 0x505   :  { %3050 = vsyncpa [#allocation3 + $0x1], 1 }
 0x506   :  { %3051 = vsyncpa [#allocation6], 1 }
 0x507   :  { %3052 = vsyncpa [#allocation9], 1 }
 0x508   :  { %3053 = vsyncpa [#allocation4], 1 }
 0x509   :  { %3055 = vsyncpa [#allocation4 + $0x1], 1 }

</bundles_post_ra>
